<compile_context>
chip_gen: v5e
topology: v5e:2x2
jax: 0.10.0
libtpu: 0.0.40
codegen_flags: <defaults>
</compile_context>

<pallas_src>
import math

import numpy as np
import jax
import jax.numpy as jnp
from jax.experimental import pallas as pl
from jax.experimental.pallas import tpu as pltpu


def _ceil_to(n, m):
    return ((n + m - 1) // m) * m


def _pad_cols(a, c):
    a = jnp.asarray(a, jnp.float32)
    return jnp.pad(a, [(0, 0)] * (a.ndim - 1) + [(0, c - a.shape[-1])])


def _pad_mat(a, r, c):
    a = jnp.asarray(a, jnp.float32)
    cfg = [(0, 0)] * (a.ndim - 2) + [(0, r - a.shape[-2]), (0, c - a.shape[-1])]
    return jnp.pad(a, cfg)


def _make_kernel(kappa, B):
    inv_b = 1.0 / float(B)
    eps = 1e-5
    neg_half_kappa = -0.5 * float(kappa)

    def kernel(x0_ref, hrow_ref, srow_ref, law_ref, xi_ref,
               W1_ref, g1_ref, be1_ref,
               W2_ref, g2_ref, be2_ref,
               Wo_ref, bo_ref,
               wa1x_ref, a1b_ref, Wa2_ref, ba2_ref,
               vW1_ref, vg1_ref, vbe1_ref,
               vW2_ref, vg2_ref, vbe2_ref,
               vW3_ref, vg3_ref, vbe3_ref,
               v_out_ref, x_out_ref, path_ref,
               x_sc, v_sc):
        i = pl.program_id(0)
        last = pl.num_programs(0) - 1

        def bn(y, gamma, beta):
            # Training-mode BatchNorm1d, single pass: sum and sum-of-squares are two
            # independent reductions; biased variance; affine folded to scale/shift.
            s1 = jnp.sum(y, axis=0, keepdims=True)
            s2 = jnp.sum(y * y, axis=0, keepdims=True)
            mu = s1 * inv_b
            var = jnp.maximum(s2 * inv_b - mu * mu, 0.0)
            scale = gamma * jax.lax.rsqrt(var + eps)
            shift = beta - mu * scale
            return y * scale + shift

        def hidden(y_pre, gamma, beta):
            # Pre-BN Linear bias omitted on purpose: cancelled exactly by the BN mean.
            return jnp.maximum(bn(y_pre, gamma, beta), 0.0)

        def dotf(a, w):
            return jnp.dot(a, w, preferred_element_type=jnp.float32)

        @pl.when(i == 0)
        def _init():
            x_sc[...] = x0_ref[...]

        x = x_sc[...]                      # f32 state carry
        xb = x.astype(jnp.bfloat16)        # bf16 MXU operand only
        h_row = hrow_ref[0]                # (1, DP): h_i broadcast across lanes
        s_row = srow_ref[0]                # (1, DP): sigma * sqrt(h_i)

        # grad-net (per-step pipelined weights) and netAlpha (time-invariant weights
        # resident; per-step time feature folded into a1b). Both first matmuls depend
        # only on x and issue back-to-back.
        h1 = hidden(dotf(xb, W1_ref[0]), g1_ref[0], be1_ref[0])
        a1 = jnp.maximum(dotf(xb, wa1x_ref[...]) + a1b_ref[0], 0.0)
        h2 = hidden(dotf(h1.astype(jnp.bfloat16), W2_ref[0]), g2_ref[0], be2_ref[0])
        grad = dotf(h2.astype(jnp.bfloat16), Wo_ref[0]) + bo_ref[0]
        alpha = dotf(a1.astype(jnp.bfloat16), Wa2_ref[...]) + ba2_ref[...]

        # v increment:
        #   -h*(kappa/2 ||x-law||^2 + 1/2 ||alpha||^2) + sigma*sqrt(h)*rowsum(grad*xi)
        # merged into ONE cross-lane reduction (padded lanes are exactly zero).
        xi = xi_ref[0]
        diff = x - law_ref[0]
        delta = (neg_half_kappa * h_row * (diff * diff)
                 - 0.5 * h_row * (alpha * alpha)
                 + s_row * (grad * xi))
        dv = jnp.sum(delta, axis=1, keepdims=True)      # (B, 1)

        @pl.when(i == 0)
        def _v0():
            z = hidden(dotf(xb, vW1_ref[...]), vg1_ref[...], vbe1_ref[...])
            z = hidden(dotf(z.astype(jnp.bfloat16), vW2_ref[...]),
                       vg2_ref[...], vbe2_ref[...])
            v0 = hidden(dotf(z.astype(jnp.bfloat16), vW3_ref[...]),
                        vg3_ref[...], vbe3_ref[...])
            v_sc[...] = v0 + dv            # lane 0 holds the real v; others carry sum(dv)

        @pl.when(i > 0)
        def _acc():
            v_sc[...] = v_sc[...] + dv

        # Euler step of the state dynamics (padded lanes stay exactly zero).
        x_new = x + h_row * alpha + s_row * xi
        x_sc[...] = x_new
        path_ref[0] = x_new                # lane-dense (B, DP) block, streamed per step

        @pl.when(i == last)
        def _fin():
            v_out_ref[...] = v_sc[...]
            x_out_ref[...] = x_new

    return kernel


def net_jentzen_forward(x0, params, law, xi, timegrid, kappa, sigma):
    (W1, _b1, g1, be1, W2, _b2, g2, be2, Wo, bo,
     vW1, _vb1, vg1, vbe1, vW2, _vb2, vg2, vbe2, vW3, _vb3, vg3, vbe3,
     wa1t, wa1x, ba1, Wa2, ba2) = params
    # _b1/_b2/_vb1/_vb2/_vb3 (pre-BatchNorm Linear biases) are mathematical no-ops
    # under batch-statistics BN and are intentionally not passed to the kernel.

    B, dim = x0.shape
    T = int(len(timegrid))
    nsteps = T - 1
    H = W1.shape[-1]
    DP = _ceil_to(dim, 128)   # lane-padded state width
    HP = _ceil_to(H, 128)     # lane-padded hidden width
    VP = 128                  # lane-padded width of the v head / v carry

    bf16 = jnp.bfloat16

    # ---- per-step scalar rows (avoid in-kernel scalar reads: broadcast across DP) ----
    tg = np.asarray(timegrid, np.float64)
    h_np = (tg[1:] - tg[:-1]).astype(np.float32)
    s_np = (float(sigma) * np.sqrt(tg[1:] - tg[:-1])).astype(np.float32)
    hrow = jnp.broadcast_to(jnp.asarray(h_np)[:, None, None], (nsteps, 1, DP))
    srow = jnp.broadcast_to(jnp.asarray(s_np)[:, None, None], (nsteps, 1, DP))

    # ---- per-step (pipelined) operands: zero-padded, weights cast to bf16 ------------
    W1p = _pad_mat(W1, DP, HP).astype(bf16)                  # (ns, DP, HP)
    g1p = _pad_cols(g1, HP)[:, None, :]                      # (ns, 1, HP) f32
    be1p = _pad_cols(be1, HP)[:, None, :]
    W2p = _pad_mat(W2, HP, HP).astype(bf16)
    g2p = _pad_cols(g2, HP)[:, None, :]
    be2p = _pad_cols(be2, HP)[:, None, :]
    Wop = _pad_mat(Wo, HP, DP).astype(bf16)
    bop = _pad_cols(bo, DP)[:, None, :]
    lawp = _pad_cols(law, DP)[:, None, :]                    # (ns, 1, DP)
    xip = _pad_cols(xi, DP)                                  # (ns, B, DP)

    # netAlpha first layer: fold the static per-step time feature into a bias.
    tcol = jnp.asarray(np.asarray(timegrid, np.float32)[:-1]).reshape(nsteps, 1)
    a1b = (tcol * _pad_cols(wa1t, HP) + _pad_cols(ba1, HP))[:, None, :]   # (ns, 1, HP)

    # ---- time-invariant (resident) operands ------------------------------------------
    wa1xp = _pad_mat(wa1x, DP, HP).astype(bf16)              # passed ONCE (no ns x copy)
    Wa2p = _pad_mat(Wa2, HP, DP).astype(bf16)
    ba2p = _pad_cols(ba2, DP)                                # (1, DP) f32

    vW1p = _pad_mat(vW1, DP, HP).astype(bf16)
    vg1p, vbe1p = _pad_cols(vg1, HP), _pad_cols(vbe1, HP)
    vW2p = _pad_mat(vW2, HP, HP).astype(bf16)
    vg2p, vbe2p = _pad_cols(vg2, HP), _pad_cols(vbe2, HP)
    vW3p = _pad_mat(vW3, HP, VP).astype(bf16)                # (HP, 128), column 0 real
    vg3p, vbe3p = _pad_cols(vg3, VP), _pad_cols(vbe3, VP)    # (1, 128)

    x0p = _pad_cols(x0, DP)

    # ---- specs ------------------------------------------------------------------------
    def step3(shape):   # per-step blocks: leading time axis, pipelined
        return pl.BlockSpec((1,) + shape, lambda i: (i, 0, 0))

    def const2(shape):  # time-invariant: full block, constant index -> fetched once
        return pl.BlockSpec(shape, lambda i: (0, 0))

    in_specs = [
        const2((B, DP)),                       # x0
        step3((1, DP)), step3((1, DP)),        # h row, sigma*sqrt(h) row
        step3((1, DP)),                        # law[i]
        step3((B, DP)),                        # xi[i]
        step3((DP, HP)), step3((1, HP)), step3((1, HP)),   # W1, g1, be1
        step3((HP, HP)), step3((1, HP)), step3((1, HP)),   # W2, g2, be2
        step3((HP, DP)), step3((1, DP)),                   # Wo, bo
        const2((DP, HP)),                      # wa1x (de-duplicated)
        step3((1, HP)),                        # a1b (folded time feature)
        const2((HP, DP)), const2((1, DP)),     # Wa2, ba2
        const2((DP, HP)), const2((1, HP)), const2((1, HP)),   # vW1, vg1, vbe1
        const2((HP, HP)), const2((1, HP)), const2((1, HP)),   # vW2, vg2, vbe2
        const2((HP, VP)), const2((1, VP)), const2((1, VP)),   # vW3, vg3, vbe3
    ]
    out_shape = (
        jax.ShapeDtypeStruct((B, VP), jnp.float32),          # v (lane 0 is the value)
        jax.ShapeDtypeStruct((B, DP), jnp.float32),          # final x (lane padded)
        jax.ShapeDtypeStruct((nsteps, B, DP), jnp.float32),  # path[1:], streamed per step
    )
    out_specs = (
        pl.BlockSpec((B, VP), lambda i: (0, 0)),
        pl.BlockSpec((B, DP), lambda i: (0, 0)),
        pl.BlockSpec((1, B, DP), lambda i: (i, 0, 0)),
    )
    scratch_shapes = [pltpu.VMEM((B, DP), jnp.float32),      # x carry
                      pltpu.VMEM((B, VP), jnp.float32)]      # v carry (lane-dense)

    # ---- VMEM budget (fail-loud): resident footprint is now T-independent -------------
    per_step = ((DP * HP + HP * HP + HP * DP) * 2                     # W1, W2, Wo (bf16)
                + (5 * HP + 4 * DP + 2 * B * DP) * 4)                 # f32 rows + xi + path slab
    invariant = ((2 * DP * HP + HP * HP + HP * DP + HP * VP) * 2      # wa1x, vW1, vW2, Wa2, vW3
                 + (3 * B * DP + 3 * B * VP) * 4                      # x0, x carry/out, v carry/out
                 + (4 * HP + 2 * DP + 2 * VP) * 4)                    # small f32 rows
    act = 8 * B * max(HP, DP) * 4                                     # live activations headroom
    vmem_limit = int(min(max(2 * per_step + invariant + act + (8 << 20), 16 << 20),
                         48 << 20))                                   # < v7x 64 MiB physical

    kernel = _make_kernel(float(kappa), B)

    v_pad, x_pad, path_steps = pl.pallas_call(
        kernel,
        out_shape=out_shape,
        grid=(nsteps,),
        in_specs=in_specs,
        out_specs=out_specs,
        scratch_shapes=scratch_shapes,
        compiler_params=pltpu.CompilerParams(
            dimension_semantics=("arbitrary",),           # time axis carries state
            vmem_limit_bytes=vmem_limit),
    )(x0p, hrow, srow, lawp, xip,
      W1p, g1p, be1p, W2p, g2p, be2p, Wop, bop,
      wa1xp, a1b, Wa2p, ba2p,
      vW1p, vg1p, vbe1p, vW2p, vg2p, vbe2p, vW3p, vg3p, vbe3p)

    # strip the lane padding back off; prepend path[0] = x0
    x0f = jnp.asarray(x0, jnp.float32)
    path = jnp.concatenate([x0f[None], path_steps[:, :, :dim]], axis=0)
    return v_pad[:, :1], x_pad[:, :dim], path


def init_params(key, dim, T):
    """Deterministic synthetic parameters mirroring the module's layer shapes.

    The pre-BN Linear biases are generated (module fidelity) but provably dead and
    dropped inside `net_jentzen_forward`.
    """
    H = dim + 10
    nsteps = T - 1
    ks = jax.random.split(key, 16)

    def w(k, shape, scale=0.3):
        return (scale * jax.random.normal(k, shape)).astype(jnp.float32)

    ones = lambda s: jnp.ones(s, jnp.float32)
    zeros = lambda s: jnp.zeros(s, jnp.float32)

    # per-timestep nets i_h1 / h1_h2 / h2_o, stacked along time
    W1 = w(ks[0], (nsteps, dim, H)); b1 = w(ks[1], (nsteps, H), 0.1)
    g1 = ones((nsteps, H)); be1 = zeros((nsteps, H))
    W2 = w(ks[2], (nsteps, H, H)); b2 = w(ks[3], (nsteps, H), 0.1)
    g2 = ones((nsteps, H)); be2 = zeros((nsteps, H))
    Wo = w(ks[4], (nsteps, H, dim)); bo = w(ks[5], (nsteps, dim), 0.1)

    # v0 network (hiddenLayer x3, last one has width 1)
    vW1 = w(ks[6], (dim, H)); vb1 = w(ks[7], (1, H), 0.1)
    vg1 = ones((1, H)); vbe1 = zeros((1, H))
    vW2 = w(ks[8], (H, H)); vb2 = w(ks[9], (1, H), 0.1)
    vg2 = ones((1, H)); vbe2 = zeros((1, H))
    vW3 = w(ks[10], (H, 1)); vb3 = w(ks[11], (1, 1), 0.1)
    vg3 = ones((1, 1)); vbe3 = zeros((1, 1))

    # synthetic netAlpha: Linear(dim+1, H) -> ReLU -> Linear(H, dim)
    wa1t = w(ks[12], (1, H))          # weight row for the time feature
    wa1x = w(ks[13], (dim, H))        # weight rows for the state features
    ba1 = zeros((1, H))
    Wa2 = w(ks[14], (H, dim)); ba2 = zeros((1, dim))

    return (W1, b1, g1, be1, W2, b2, g2, be2, Wo, bo,
            vW1, vb1, vg1, vbe1, vW2, vb2, vg2, vbe2, vW3, vb3, vg3, vbe3,
            wa1t, wa1x, ba1, Wa2, ba2)


if __name__ == "__main__":
    dim, B, T = 4, 8, 8          # state dim, batch, number of time points
    kappa, sigma = 1.0, 0.5
    timegrid = np.linspace(0.0, 1.0, T)

    key = jax.random.PRNGKey(0)
    k_x, k_law, k_xi, k_p = jax.random.split(key, 4)
    x0 = jax.random.normal(k_x, (B, dim), jnp.float32)
    law = 0.1 * jax.random.normal(k_law, (T - 1, dim), jnp.float32)
    xi = jax.random.normal(k_xi, (T - 1, B, dim), jnp.float32)  # Brownian increments
    params = init_params(k_p, dim, T)

    v, x_T, path = net_jentzen_forward(x0, params, law, xi, timegrid, kappa, sigma)
    jax.block_until_ready((v, x_T, path))

    assert v.shape == (B, 1) and x_T.shape == (B, dim) and path.shape == (T, B, dim)
    assert bool(jnp.all(jnp.isfinite(v))) and bool(jnp.all(jnp.isfinite(path)))
    print("KERNEL_OK")
</pallas_src>

<mosaic_0001>
module attributes {stable_mosaic.version = 11 : i64} {
  func.func @kernel(%arg0: i32, %arg1: memref<8x128xf32, #tpu.memory_space<vmem>>, %arg2: memref<1x1x128xf32, #tpu.memory_space<vmem>>, %arg3: memref<1x1x128xf32, #tpu.memory_space<vmem>>, %arg4: memref<1x1x128xf32, #tpu.memory_space<vmem>>, %arg5: memref<1x8x128xf32, #tpu.memory_space<vmem>>, %arg6: memref<1x128x128xbf16, #tpu.memory_space<vmem>>, %arg7: memref<1x1x128xf32, #tpu.memory_space<vmem>>, %arg8: memref<1x1x128xf32, #tpu.memory_space<vmem>>, %arg9: memref<1x128x128xbf16, #tpu.memory_space<vmem>>, %arg10: memref<1x1x128xf32, #tpu.memory_space<vmem>>, %arg11: memref<1x1x128xf32, #tpu.memory_space<vmem>>, %arg12: memref<1x128x128xbf16, #tpu.memory_space<vmem>>, %arg13: memref<1x1x128xf32, #tpu.memory_space<vmem>>, %arg14: memref<128x128xbf16, #tpu.memory_space<vmem>>, %arg15: memref<1x1x128xf32, #tpu.memory_space<vmem>>, %arg16: memref<128x128xbf16, #tpu.memory_space<vmem>>, %arg17: memref<1x128xf32, #tpu.memory_space<vmem>>, %arg18: memref<128x128xbf16, #tpu.memory_space<vmem>>, %arg19: memref<1x128xf32, #tpu.memory_space<vmem>>, %arg20: memref<1x128xf32, #tpu.memory_space<vmem>>, %arg21: memref<128x128xbf16, #tpu.memory_space<vmem>>, %arg22: memref<1x128xf32, #tpu.memory_space<vmem>>, %arg23: memref<1x128xf32, #tpu.memory_space<vmem>>, %arg24: memref<128x128xbf16, #tpu.memory_space<vmem>>, %arg25: memref<1x128xf32, #tpu.memory_space<vmem>>, %arg26: memref<1x128xf32, #tpu.memory_space<vmem>>, %arg27: memref<8x128xf32, #tpu.memory_space<vmem>>, %arg28: memref<8x128xf32, #tpu.memory_space<vmem>>, %arg29: memref<1x8x128xf32, #tpu.memory_space<vmem>>, %arg30: memref<8x128xf32, #tpu.memory_space<vmem>>, %arg31: memref<8x128xf32, #tpu.memory_space<vmem>>) attributes {dimension_semantics = [#tpu.dimension_semantics<arbitrary>], iteration_bounds = array<i64: 7>, scalar_prefetch = 0 : i64, scratch_operands = 2 : i64, tpu.core_type = #tpu.core_type<tc>, window_params = [{pipeline_mode = #tpu.pipeline_mode<synchronous>, transform_indices = @transform_0, window_bounds = array<i64: 8, 128>}, {transform_indices = @transform_1, window_bounds = array<i64: 1, 1, 128>}, {transform_indices = @transform_2, window_bounds = array<i64: 1, 1, 128>}, {transform_indices = @transform_3, window_bounds = array<i64: 1, 1, 128>}, {transform_indices = @transform_4, window_bounds = array<i64: 1, 8, 128>}, {transform_indices = @transform_5, window_bounds = array<i64: 1, 128, 128>}, {transform_indices = @transform_6, window_bounds = array<i64: 1, 1, 128>}, {transform_indices = @transform_7, window_bounds = array<i64: 1, 1, 128>}, {transform_indices = @transform_8, window_bounds = array<i64: 1, 128, 128>}, {transform_indices = @transform_9, window_bounds = array<i64: 1, 1, 128>}, {transform_indices = @transform_10, window_bounds = array<i64: 1, 1, 128>}, {transform_indices = @transform_11, window_bounds = array<i64: 1, 128, 128>}, {transform_indices = @transform_12, window_bounds = array<i64: 1, 1, 128>}, {pipeline_mode = #tpu.pipeline_mode<synchronous>, transform_indices = @transform_13, window_bounds = array<i64: 128, 128>}, {transform_indices = @transform_14, window_bounds = array<i64: 1, 1, 128>}, {pipeline_mode = #tpu.pipeline_mode<synchronous>, transform_indices = @transform_15, window_bounds = array<i64: 128, 128>}, {pipeline_mode = #tpu.pipeline_mode<synchronous>, transform_indices = @transform_16, window_bounds = array<i64: 1, 128>}, {pipeline_mode = #tpu.pipeline_mode<synchronous>, transform_indices = @transform_17, window_bounds = array<i64: 128, 128>}, {pipeline_mode = #tpu.pipeline_mode<synchronous>, transform_indices = @transform_18, window_bounds = array<i64: 1, 128>}, {pipeline_mode = #tpu.pipeline_mode<synchronous>, transform_indices = @transform_19, window_bounds = array<i64: 1, 128>}, {pipeline_mode = #tpu.pipeline_mode<synchronous>, transform_indices = @transform_20, window_bounds = array<i64: 128, 128>}, {pipeline_mode = #tpu.pipeline_mode<synchronous>, transform_indices = @transform_21, window_bounds = array<i64: 1, 128>}, {pipeline_mode = #tpu.pipeline_mode<synchronous>, transform_indices = @transform_22, window_bounds = array<i64: 1, 128>}, {pipeline_mode = #tpu.pipeline_mode<synchronous>, transform_indices = @transform_23, window_bounds = array<i64: 128, 128>}, {pipeline_mode = #tpu.pipeline_mode<synchronous>, transform_indices = @transform_24, window_bounds = array<i64: 1, 128>}, {pipeline_mode = #tpu.pipeline_mode<synchronous>, transform_indices = @transform_25, window_bounds = array<i64: 1, 128>}, {pipeline_mode = #tpu.pipeline_mode<synchronous>, transform_indices = @transform_26, window_bounds = array<i64: 8, 128>}, {pipeline_mode = #tpu.pipeline_mode<synchronous>, transform_indices = @transform_27, window_bounds = array<i64: 8, 128>}, {transform_indices = @transform_28, window_bounds = array<i64: 1, 8, 128>}]} {
    %c0_i32 = arith.constant 0 : i32
    %0 = arith.cmpi eq, %arg0, %c0_i32 : i32
    %1 = arith.extui %0 : i1 to i32
    %c0_i32_0 = arith.constant 0 : i32
    %2 = arith.cmpi ne, %1, %c0_i32_0 : i32
    scf.if %2 {
      %c0_79 = arith.constant 0 : index
      %c0_80 = arith.constant 0 : index
      %138 = vector.load %arg1[%c0_79, %c0_80] : memref<8x128xf32, #tpu.memory_space<vmem>>, vector<8x128xf32>
      %c0_81 = arith.constant 0 : index
      %c0_82 = arith.constant 0 : index
      %139 = vector.load %arg30[%c0_81, %c0_82] : memref<8x128xf32, #tpu.memory_space<vmem>>, vector<8x128xf32>
      tpu.vector_store %arg30[%c0_81, %c0_82], %138 {strides = array<i32>} : memref<8x128xf32, #tpu.memory_space<vmem>>, vector<8x128xf32>,
    } else {
    }
    %c0 = arith.constant 0 : index
    %c0_1 = arith.constant 0 : index
    %3 = vector.load %arg30[%c0, %c0_1] : memref<8x128xf32, #tpu.memory_space<vmem>>, vector<8x128xf32>
    %4 = arith.truncf %3 : vector<8x128xf32> to vector<8x128xbf16>
    %c0_2 = arith.constant 0 : index
    %c0_3 = arith.constant 0 : index
    %c0_4 = arith.constant 0 : index
    %5 = vector.load %arg2[%c0_2, %c0_3, %c0_4] : memref<1x1x128xf32, #tpu.memory_space<vmem>>, vector<1x1x128xf32>
    %6 = vector.shape_cast %5 : vector<1x1x128xf32> to vector<1x128xf32>
    %c0_5 = arith.constant 0 : index
    %c0_6 = arith.constant 0 : index
    %c0_7 = arith.constant 0 : index
    %7 = vector.load %arg3[%c0_5, %c0_6, %c0_7] : memref<1x1x128xf32, #tpu.memory_space<vmem>>, vector<1x1x128xf32>
    %8 = vector.shape_cast %7 : vector<1x1x128xf32> to vector<1x128xf32>
    %c0_8 = arith.constant 0 : index
    %c0_9 = arith.constant 0 : index
    %c0_10 = arith.constant 0 : index
    %9 = vector.load %arg6[%c0_8, %c0_9, %c0_10] : memref<1x128x128xbf16, #tpu.memory_space<vmem>>, vector<1x128x128xbf16>
    %10 = vector.shape_cast %9 : vector<1x128x128xbf16> to vector<128x128xbf16>
    %cst = arith.constant dense<0.000000e+00> : vector<8x128xf32>
    %11 = tpu.matmul %4, %10, %cst {dimension_numbers = #tpu.dot_dimension_numbers<[1], [0], [0], [1], [0, 0, 1, 1], [], []>} : vector<8x128xbf16>, vector<128x128xbf16>, vector<8x128xf32> -> vector<8x128xf32>
    %c0_11 = arith.constant 0 : index
    %c0_12 = arith.constant 0 : index
    %c0_13 = arith.constant 0 : index
    %12 = vector.load %arg7[%c0_11, %c0_12, %c0_13] : memref<1x1x128xf32, #tpu.memory_space<vmem>>, vector<1x1x128xf32>
    %13 = vector.shape_cast %12 : vector<1x1x128xf32> to vector<1x128xf32>
    %c0_14 = arith.constant 0 : index
    %c0_15 = arith.constant 0 : index
    %c0_16 = arith.constant 0 : index
    %14 = vector.load %arg8[%c0_14, %c0_15, %c0_16] : memref<1x1x128xf32, #tpu.memory_space<vmem>>, vector<1x1x128xf32>
    %15 = vector.shape_cast %14 : vector<1x1x128xf32> to vector<1x128xf32>
    %cst_17 = arith.constant dense<0.000000e+00> : vector<128xf32>
    %16 = vector.multi_reduction <add>, %11, %cst_17 [0] : vector<8x128xf32> to vector<128xf32>
    %17 = vector.shape_cast %16 : vector<128xf32> to vector<1x128xf32>
    %18 = arith.mulf %11, %11 : vector<8x128xf32>
    %cst_18 = arith.constant dense<0.000000e+00> : vector<128xf32>
    %19 = vector.multi_reduction <add>, %18, %cst_18 [0] : vector<8x128xf32> to vector<128xf32>
    %20 = vector.shape_cast %19 : vector<128xf32> to vector<1x128xf32>
    %cst_19 = arith.constant 1.250000e-01 : f32
    %21 = vector.broadcast %cst_19 : f32 to vector<1x128xf32>
    %22 = arith.mulf %17, %21 : vector<1x128xf32>
    %cst_20 = arith.constant 1.250000e-01 : f32
    %23 = vector.broadcast %cst_20 : f32 to vector<1x128xf32>
    %24 = arith.mulf %20, %23 : vector<1x128xf32>
    %25 = arith.mulf %22, %22 : vector<1x128xf32>
    %26 = arith.subf %24, %25 : vector<1x128xf32>
    %cst_21 = arith.constant 0.000000e+00 : f32
    %27 = vector.broadcast %cst_21 : f32 to vector<1x128xf32>
    %28 = arith.maximumf %26, %27 : vector<1x128xf32>
    %cst_22 = arith.constant 9.99999974E-6 : f32
    %29 = vector.broadcast %cst_22 : f32 to vector<1x128xf32>
    %30 = arith.addf %28, %29 : vector<1x128xf32>
    %31 = math.rsqrt %30 : vector<1x128xf32>
    %32 = arith.mulf %13, %31 : vector<1x128xf32>
    %33 = arith.mulf %22, %32 : vector<1x128xf32>
    %34 = arith.subf %15, %33 : vector<1x128xf32>
    %35 = vector.broadcast %32 : vector<1x128xf32> to vector<8x128xf32>
    %36 = arith.mulf %11, %35 : vector<8x128xf32>
    %37 = vector.broadcast %34 : vector<1x128xf32> to vector<8x128xf32>
    %38 = arith.addf %36, %37 : vector<8x128xf32>
    %cst_23 = arith.constant 0.000000e+00 : f32
    %39 = vector.broadcast %cst_23 : f32 to vector<8x128xf32>
    %40 = arith.maximumf %38, %39 : vector<8x128xf32>
    %c0_24 = arith.constant 0 : index
    %c0_25 = arith.constant 0 : index
    %41 = vector.load %arg14[%c0_24, %c0_25] : memref<128x128xbf16, #tpu.memory_space<vmem>>, vector<128x128xbf16>
    %cst_26 = arith.constant dense<0.000000e+00> : vector<8x128xf32>
    %42 = tpu.matmul %4, %41, %cst_26 {dimension_numbers = #tpu.dot_dimension_numbers<[1], [0], [0], [1], [0, 0, 1, 1], [], []>} : vector<8x128xbf16>, vector<128x128xbf16>, vector<8x128xf32> -> vector<8x128xf32>
    %c0_27 = arith.constant 0 : index
    %c0_28 = arith.constant 0 : index
    %c0_29 = arith.constant 0 : index
    %43 = vector.load %arg15[%c0_27, %c0_28, %c0_29] : memref<1x1x128xf32, #tpu.memory_space<vmem>>, vector<1x1x128xf32>
    %44 = vector.shape_cast %43 : vector<1x1x128xf32> to vector<1x128xf32>
    %45 = vector.broadcast %44 : vector<1x128xf32> to vector<8x128xf32>
    %46 = arith.addf %42, %45 : vector<8x128xf32>
    %cst_30 = arith.constant 0.000000e+00 : f32
    %47 = vector.broadcast %cst_30 : f32 to vector<8x128xf32>
    %48 = arith.maximumf %46, %47 : vector<8x128xf32>
    %49 = arith.truncf %40 : vector<8x128xf32> to vector<8x128xbf16>
    %c0_31 = arith.constant 0 : index
    %c0_32 = arith.constant 0 : index
    %c0_33 = arith.constant 0 : index
    %50 = vector.load %arg9[%c0_31, %c0_32, %c0_33] : memref<1x128x128xbf16, #tpu.memory_space<vmem>>, vector<1x128x128xbf16>
    %51 = vector.shape_cast %50 : vector<1x128x128xbf16> to vector<128x128xbf16>
    %cst_34 = arith.constant dense<0.000000e+00> : vector<8x128xf32>
    %52 = tpu.matmul %49, %51, %cst_34 {dimension_numbers = #tpu.dot_dimension_numbers<[1], [0], [0], [1], [0, 0, 1, 1], [], []>} : vector<8x128xbf16>, vector<128x128xbf16>, vector<8x128xf32> -> vector<8x128xf32>
    %c0_35 = arith.constant 0 : index
    %c0_36 = arith.constant 0 : index
    %c0_37 = arith.constant 0 : index
    %53 = vector.load %arg10[%c0_35, %c0_36, %c0_37] : memref<1x1x128xf32, #tpu.memory_space<vmem>>, vector<1x1x128xf32>
    %54 = vector.shape_cast %53 : vector<1x1x128xf32> to vector<1x128xf32>
    %c0_38 = arith.constant 0 : index
    %c0_39 = arith.constant 0 : index
    %c0_40 = arith.constant 0 : index
    %55 = vector.load %arg11[%c0_38, %c0_39, %c0_40] : memref<1x1x128xf32, #tpu.memory_space<vmem>>, vector<1x1x128xf32>
    %56 = vector.shape_cast %55 : vector<1x1x128xf32> to vector<1x128xf32>
    %cst_41 = arith.constant dense<0.000000e+00> : vector<128xf32>
    %57 = vector.multi_reduction <add>, %52, %cst_41 [0] : vector<8x128xf32> to vector<128xf32>
    %58 = vector.shape_cast %57 : vector<128xf32> to vector<1x128xf32>
    %59 = arith.mulf %52, %52 : vector<8x128xf32>
    %cst_42 = arith.constant dense<0.000000e+00> : vector<128xf32>
    %60 = vector.multi_reduction <add>, %59, %cst_42 [0] : vector<8x128xf32> to vector<128xf32>
    %61 = vector.shape_cast %60 : vector<128xf32> to vector<1x128xf32>
    %cst_43 = arith.constant 1.250000e-01 : f32
    %62 = vector.broadcast %cst_43 : f32 to vector<1x128xf32>
    %63 = arith.mulf %58, %62 : vector<1x128xf32>
    %cst_44 = arith.constant 1.250000e-01 : f32
    %64 = vector.broadcast %cst_44 : f32 to vector<1x128xf32>
    %65 = arith.mulf %61, %64 : vector<1x128xf32>
    %66 = arith.mulf %63, %63 : vector<1x128xf32>
    %67 = arith.subf %65, %66 : vector<1x128xf32>
    %cst_45 = arith.constant 0.000000e+00 : f32
    %68 = vector.broadcast %cst_45 : f32 to vector<1x128xf32>
    %69 = arith.maximumf %67, %68 : vector<1x128xf32>
    %cst_46 = arith.constant 9.99999974E-6 : f32
    %70 = vector.broadcast %cst_46 : f32 to vector<1x128xf32>
    %71 = arith.addf %69, %70 : vector<1x128xf32>
    %72 = math.rsqrt %71 : vector<1x128xf32>
    %73 = arith.mulf %54, %72 : vector<1x128xf32>
    %74 = arith.mulf %63, %73 : vector<1x128xf32>
    %75 = arith.subf %56, %74 : vector<1x128xf32>
    %76 = vector.broadcast %73 : vector<1x128xf32> to vector<8x128xf32>
    %77 = arith.mulf %52, %76 : vector<8x128xf32>
    %78 = vector.broadcast %75 : vector<1x128xf32> to vector<8x128xf32>
    %79 = arith.addf %77, %78 : vector<8x128xf32>
    %cst_47 = arith.constant 0.000000e+00 : f32
    %80 = vector.broadcast %cst_47 : f32 to vector<8x128xf32>
    %81 = arith.maximumf %79, %80 : vector<8x128xf32>
    %82 = arith.truncf %81 : vector<8x128xf32> to vector<8x128xbf16>
    %c0_48 = arith.constant 0 : index
    %c0_49 = arith.constant 0 : index
    %c0_50 = arith.constant 0 : index
    %83 = vector.load %arg12[%c0_48, %c0_49, %c0_50] : memref<1x128x128xbf16, #tpu.memory_space<vmem>>, vector<1x128x128xbf16>
    %84 = vector.shape_cast %83 : vector<1x128x128xbf16> to vector<128x128xbf16>
    %cst_51 = arith.constant dense<0.000000e+00> : vector<8x128xf32>
    %85 = tpu.matmul %82, %84, %cst_51 {dimension_numbers = #tpu.dot_dimension_numbers<[1], [0], [0], [1], [0, 0, 1, 1], [], []>} : vector<8x128xbf16>, vector<128x128xbf16>, vector<8x128xf32> -> vector<8x128xf32>
    %c0_52 = arith.constant 0 : index
    %c0_53 = arith.constant 0 : index
    %c0_54 = arith.constant 0 : index
    %86 = vector.load %arg13[%c0_52, %c0_53, %c0_54] : memref<1x1x128xf32, #tpu.memory_space<vmem>>, vector<1x1x128xf32>
    %87 = vector.shape_cast %86 : vector<1x1x128xf32> to vector<1x128xf32>
    %88 = vector.broadcast %87 : vector<1x128xf32> to vector<8x128xf32>
    %89 = arith.addf %85, %88 : vector<8x128xf32>
    %90 = arith.truncf %48 : vector<8x128xf32> to vector<8x128xbf16>
    %c0_55 = arith.constant 0 : index
    %c0_56 = arith.constant 0 : index
    %91 = vector.load %arg16[%c0_55, %c0_56] : memref<128x128xbf16, #tpu.memory_space<vmem>>, vector<128x128xbf16>
    %cst_57 = arith.constant dense<0.000000e+00> : vector<8x128xf32>
    %92 = tpu.matmul %90, %91, %cst_57 {dimension_numbers = #tpu.dot_dimension_numbers<[1], [0], [0], [1], [0, 0, 1, 1], [], []>} : vector<8x128xbf16>, vector<128x128xbf16>, vector<8x128xf32> -> vector<8x128xf32>
    %c0_58 = arith.constant 0 : index
    %c0_59 = arith.constant 0 : index
    %93 = vector.load %arg17[%c0_58, %c0_59] : memref<1x128xf32, #tpu.memory_space<vmem>>, vector<1x128xf32>
    %94 = vector.broadcast %93 : vector<1x128xf32> to vector<8x128xf32>
    %95 = arith.addf %92, %94 : vector<8x128xf32>
    %c0_60 = arith.constant 0 : index
    %c0_61 = arith.constant 0 : index
    %c0_62 = arith.constant 0 : index
    %96 = vector.load %arg5[%c0_60, %c0_61, %c0_62] : memref<1x8x128xf32, #tpu.memory_space<vmem>>, vector<1x8x128xf32>
    %97 = vector.shape_cast %96 : vector<1x8x128xf32> to vector<8x128xf32>
    %c0_63 = arith.constant 0 : index
    %c0_64 = arith.constant 0 : index
    %c0_65 = arith.constant 0 : index
    %98 = vector.load %arg4[%c0_63, %c0_64, %c0_65] : memref<1x1x128xf32, #tpu.memory_space<vmem>>, vector<1x1x128xf32>
    %99 = vector.shape_cast %98 : vector<1x1x128xf32> to vector<1x128xf32>
    %100 = vector.broadcast %99 : vector<1x128xf32> to vector<8x128xf32>
    %101 = arith.subf %3, %100 : vector<8x128xf32>
    %cst_66 = arith.constant -5.000000e-01 : f32
    %102 = vector.broadcast %cst_66 : f32 to vector<1x128xf32>
    %103 = arith.mulf %102, %6 : vector<1x128xf32>
    %104 = arith.mulf %101, %101 : vector<8x128xf32>
    %105 = vector.broadcast %103 : vector<1x128xf32> to vector<8x128xf32>
    %106 = arith.mulf %105, %104 : vector<8x128xf32>
    %cst_67 = arith.constant 5.000000e-01 : f32
    %107 = vector.broadcast %cst_67 : f32 to vector<1x128xf32>
    %108 = arith.mulf %107, %6 : vector<1x128xf32>
    %109 = arith.mulf %95, %95 : vector<8x128xf32>
    %110 = vector.broadcast %108 : vector<1x128xf32> to vector<8x128xf32>
    %111 = arith.mulf %110, %109 : vector<8x128xf32>
    %112 = arith.subf %106, %111 : vector<8x128xf32>
    %113 = arith.mulf %89, %97 : vector<8x128xf32>
    %114 = vector.broadcast %8 : vector<1x128xf32> to vector<8x128xf32>
    %115 = arith.mulf %114, %113 : vector<8x128xf32>
    %116 = arith.addf %112, %115 : vector<8x128xf32>
    %cst_68 = arith.constant dense<0.000000e+00> : vector<8xf32>
    %117 = vector.multi_reduction <add>, %116, %cst_68 [1] : vector<8x128xf32> to vector<8xf32>
    %118 = vector.shape_cast %117 : vector<8xf32> to vector<8x1xf32>
    %c0_i32_69 = arith.constant 0 : i32
    %119 = arith.cmpi eq, %arg0, %c0_i32_69 : i32
    %120 = arith.extui %119 : i1 to i32
    %c0_i32_70 = arith.constant 0 : i32
    %121 = arith.cmpi ne, %120, %c0_i32_70 : i32
    scf.if %121 {
      %c0_79 = arith.constant 0 : index
      %c0_80 = arith.constant 0 : index
      %138 = vector.load %arg18[%c0_79, %c0_80] : memref<128x128xbf16, #tpu.memory_space<vmem>>, vector<128x128xbf16>
      %cst_81 = arith.constant dense<0.000000e+00> : vector<8x128xf32>
      %139 = tpu.matmul %4, %138, %cst_81 {dimension_numbers = #tpu.dot_dimension_numbers<[1], [0], [0], [1], [0, 0, 1, 1], [], []>} : vector<8x128xbf16>, vector<128x128xbf16>, vector<8x128xf32> -> vector<8x128xf32>
      %c0_82 = arith.constant 0 : index
      %c0_83 = arith.constant 0 : index
      %140 = vector.load %arg19[%c0_82, %c0_83] : memref<1x128xf32, #tpu.memory_space<vmem>>, vector<1x128xf32>
      %c0_84 = arith.constant 0 : index
      %c0_85 = arith.constant 0 : index
      %141 = vector.load %arg20[%c0_84, %c0_85] : memref<1x128xf32, #tpu.memory_space<vmem>>, vector<1x128xf32>
      %cst_86 = arith.constant dense<0.000000e+00> : vector<128xf32>
      %142 = vector.multi_reduction <add>, %139, %cst_86 [0] : vector<8x128xf32> to vector<128xf32>
      %143 = vector.shape_cast %142 : vector<128xf32> to vector<1x128xf32>
      %144 = arith.mulf %139, %139 : vector<8x128xf32>
      %cst_87 = arith.constant dense<0.000000e+00> : vector<128xf32>
      %145 = vector.multi_reduction <add>, %144, %cst_87 [0] : vector<8x128xf32> to vector<128xf32>
      %146 = vector.shape_cast %145 : vector<128xf32> to vector<1x128xf32>
      %cst_88 = arith.constant 1.250000e-01 : f32
      %147 = vector.broadcast %cst_88 : f32 to vector<1x128xf32>
      %148 = arith.mulf %143, %147 : vector<1x128xf32>
      %cst_89 = arith.constant 1.250000e-01 : f32
      %149 = vector.broadcast %cst_89 : f32 to vector<1x128xf32>
      %150 = arith.mulf %146, %149 : vector<1x128xf32>
      %151 = arith.mulf %148, %148 : vector<1x128xf32>
      %152 = arith.subf %150, %151 : vector<1x128xf32>
      %cst_90 = arith.constant 0.000000e+00 : f32
      %153 = vector.broadcast %cst_90 : f32 to vector<1x128xf32>
      %154 = arith.maximumf %152, %153 : vector<1x128xf32>
      %cst_91 = arith.constant 9.99999974E-6 : f32
      %155 = vector.broadcast %cst_91 : f32 to vector<1x128xf32>
      %156 = arith.addf %154, %155 : vector<1x128xf32>
      %157 = math.rsqrt %156 : vector<1x128xf32>
      %158 = arith.mulf %140, %157 : vector<1x128xf32>
      %159 = arith.mulf %148, %158 : vector<1x128xf32>
      %160 = arith.subf %141, %159 : vector<1x128xf32>
      %161 = vector.broadcast %158 : vector<1x128xf32> to vector<8x128xf32>
      %162 = arith.mulf %139, %161 : vector<8x128xf32>
      %163 = vector.broadcast %160 : vector<1x128xf32> to vector<8x128xf32>
      %164 = arith.addf %162, %163 : vector<8x128xf32>
      %cst_92 = arith.constant 0.000000e+00 : f32
      %165 = vector.broadcast %cst_92 : f32 to vector<8x128xf32>
      %166 = arith.maximumf %164, %165 : vector<8x128xf32>
      %167 = arith.truncf %166 : vector<8x128xf32> to vector<8x128xbf16>
      %c0_93 = arith.constant 0 : index
      %c0_94 = arith.constant 0 : index
      %168 = vector.load %arg21[%c0_93, %c0_94] : memref<128x128xbf16, #tpu.memory_space<vmem>>, vector<128x128xbf16>
      %cst_95 = arith.constant dense<0.000000e+00> : vector<8x128xf32>
      %169 = tpu.matmul %167, %168, %cst_95 {dimension_numbers = #tpu.dot_dimension_numbers<[1], [0], [0], [1], [0, 0, 1, 1], [], []>} : vector<8x128xbf16>, vector<128x128xbf16>, vector<8x128xf32> -> vector<8x128xf32>
      %c0_96 = arith.constant 0 : index
      %c0_97 = arith.constant 0 : index
      %170 = vector.load %arg22[%c0_96, %c0_97] : memref<1x128xf32, #tpu.memory_space<vmem>>, vector<1x128xf32>
      %c0_98 = arith.constant 0 : index
      %c0_99 = arith.constant 0 : index
      %171 = vector.load %arg23[%c0_98, %c0_99] : memref<1x128xf32, #tpu.memory_space<vmem>>, vector<1x128xf32>
      %cst_100 = arith.constant dense<0.000000e+00> : vector<128xf32>
      %172 = vector.multi_reduction <add>, %169, %cst_100 [0] : vector<8x128xf32> to vector<128xf32>
      %173 = vector.shape_cast %172 : vector<128xf32> to vector<1x128xf32>
      %174 = arith.mulf %169, %169 : vector<8x128xf32>
      %cst_101 = arith.constant dense<0.000000e+00> : vector<128xf32>
      %175 = vector.multi_reduction <add>, %174, %cst_101 [0] : vector<8x128xf32> to vector<128xf32>
      %176 = vector.shape_cast %175 : vector<128xf32> to vector<1x128xf32>
      %cst_102 = arith.constant 1.250000e-01 : f32
      %177 = vector.broadcast %cst_102 : f32 to vector<1x128xf32>
      %178 = arith.mulf %173, %177 : vector<1x128xf32>
      %cst_103 = arith.constant 1.250000e-01 : f32
      %179 = vector.broadcast %cst_103 : f32 to vector<1x128xf32>
      %180 = arith.mulf %176, %179 : vector<1x128xf32>
      %181 = arith.mulf %178, %178 : vector<1x128xf32>
      %182 = arith.subf %180, %181 : vector<1x128xf32>
      %cst_104 = arith.constant 0.000000e+00 : f32
      %183 = vector.broadcast %cst_104 : f32 to vector<1x128xf32>
      %184 = arith.maximumf %182, %183 : vector<1x128xf32>
      %cst_105 = arith.constant 9.99999974E-6 : f32
      %185 = vector.broadcast %cst_105 : f32 to vector<1x128xf32>
      %186 = arith.addf %184, %185 : vector<1x128xf32>
      %187 = math.rsqrt %186 : vector<1x128xf32>
      %188 = arith.mulf %170, %187 : vector<1x128xf32>
      %189 = arith.mulf %178, %188 : vector<1x128xf32>
      %190 = arith.subf %171, %189 : vector<1x128xf32>
      %191 = vector.broadcast %188 : vector<1x128xf32> to vector<8x128xf32>
      %192 = arith.mulf %169, %191 : vector<8x128xf32>
      %193 = vector.broadcast %190 : vector<1x128xf32> to vector<8x128xf32>
      %194 = arith.addf %192, %193 : vector<8x128xf32>
      %cst_106 = arith.constant 0.000000e+00 : f32
      %195 = vector.broadcast %cst_106 : f32 to vector<8x128xf32>
      %196 = arith.maximumf %194, %195 : vector<8x128xf32>
      %197 = arith.truncf %196 : vector<8x128xf32> to vector<8x128xbf16>
      %c0_107 = arith.constant 0 : index
      %c0_108 = arith.constant 0 : index
      %198 = vector.load %arg24[%c0_107, %c0_108] : memref<128x128xbf16, #tpu.memory_space<vmem>>, vector<128x128xbf16>
      %cst_109 = arith.constant dense<0.000000e+00> : vector<8x128xf32>
      %199 = tpu.matmul %197, %198, %cst_109 {dimension_numbers = #tpu.dot_dimension_numbers<[1], [0], [0], [1], [0, 0, 1, 1], [], []>} : vector<8x128xbf16>, vector<128x128xbf16>, vector<8x128xf32> -> vector<8x128xf32>
      %c0_110 = arith.constant 0 : index
      %c0_111 = arith.constant 0 : index
      %200 = vector.load %arg25[%c0_110, %c0_111] : memref<1x128xf32, #tpu.memory_space<vmem>>, vector<1x128xf32>
      %c0_112 = arith.constant 0 : index
      %c0_113 = arith.constant 0 : index
      %201 = vector.load %arg26[%c0_112, %c0_113] : memref<1x128xf32, #tpu.memory_space<vmem>>, vector<1x128xf32>
      %cst_114 = arith.constant dense<0.000000e+00> : vector<128xf32>
      %202 = vector.multi_reduction <add>, %199, %cst_114 [0] : vector<8x128xf32> to vector<128xf32>
      %203 = vector.shape_cast %202 : vector<128xf32> to vector<1x128xf32>
      %204 = arith.mulf %199, %199 : vector<8x128xf32>
      %cst_115 = arith.constant dense<0.000000e+00> : vector<128xf32>
      %205 = vector.multi_reduction <add>, %204, %cst_115 [0] : vector<8x128xf32> to vector<128xf32>
      %206 = vector.shape_cast %205 : vector<128xf32> to vector<1x128xf32>
      %cst_116 = arith.constant 1.250000e-01 : f32
      %207 = vector.broadcast %cst_116 : f32 to vector<1x128xf32>
      %208 = arith.mulf %203, %207 : vector<1x128xf32>
      %cst_117 = arith.constant 1.250000e-01 : f32
      %209 = vector.broadcast %cst_117 : f32 to vector<1x128xf32>
      %210 = arith.mulf %206, %209 : vector<1x128xf32>
      %211 = arith.mulf %208, %208 : vector<1x128xf32>
      %212 = arith.subf %210, %211 : vector<1x128xf32>
      %cst_118 = arith.constant 0.000000e+00 : f32
      %213 = vector.broadcast %cst_118 : f32 to vector<1x128xf32>
      %214 = arith.maximumf %212, %213 : vector<1x128xf32>
      %cst_119 = arith.constant 9.99999974E-6 : f32
      %215 = vector.broadcast %cst_119 : f32 to vector<1x128xf32>
      %216 = arith.addf %214, %215 : vector<1x128xf32>
      %217 = math.rsqrt %216 : vector<1x128xf32>
      %218 = arith.mulf %200, %217 : vector<1x128xf32>
      %219 = arith.mulf %208, %218 : vector<1x128xf32>
      %220 = arith.subf %201, %219 : vector<1x128xf32>
      %221 = vector.broadcast %218 : vector<1x128xf32> to vector<8x128xf32>
      %222 = arith.mulf %199, %221 : vector<8x128xf32>
      %223 = vector.broadcast %220 : vector<1x128xf32> to vector<8x128xf32>
      %224 = arith.addf %222, %223 : vector<8x128xf32>
      %cst_120 = arith.constant 0.000000e+00 : f32
      %225 = vector.broadcast %cst_120 : f32 to vector<8x128xf32>
      %226 = arith.maximumf %224, %225 : vector<8x128xf32>
      %227 = vector.broadcast %118 : vector<8x1xf32> to vector<8x128xf32>
      %228 = arith.addf %226, %227 : vector<8x128xf32>
      %c0_121 = arith.constant 0 : index
      %c0_122 = arith.constant 0 : index
      %229 = vector.load %arg31[%c0_121, %c0_122] : memref<8x128xf32, #tpu.memory_space<vmem>>, vector<8x128xf32>
      tpu.vector_store %arg31[%c0_121, %c0_122], %228 {strides = array<i32>} : memref<8x128xf32, #tpu.memory_space<vmem>>, vector<8x128xf32>,
    } else {
    }
    %c0_i32_71 = arith.constant 0 : i32
    %122 = arith.cmpi sgt, %arg0, %c0_i32_71 : i32
    %123 = arith.extui %122 : i1 to i32
    %c0_i32_72 = arith.constant 0 : i32
    %124 = arith.cmpi ne, %123, %c0_i32_72 : i32
    scf.if %124 {
      %c0_79 = arith.constant 0 : index
      %c0_80 = arith.constant 0 : index
      %138 = vector.load %arg31[%c0_79, %c0_80] : memref<8x128xf32, #tpu.memory_space<vmem>>, vector<8x128xf32>
      %139 = vector.broadcast %118 : vector<8x1xf32> to vector<8x128xf32>
      %140 = arith.addf %138, %139 : vector<8x128xf32>
      %c0_81 = arith.constant 0 : index
      %c0_82 = arith.constant 0 : index
      %141 = vector.load %arg31[%c0_81, %c0_82] : memref<8x128xf32, #tpu.memory_space<vmem>>, vector<8x128xf32>
      tpu.vector_store %arg31[%c0_81, %c0_82], %140 {strides = array<i32>} : memref<8x128xf32, #tpu.memory_space<vmem>>, vector<8x128xf32>,
    } else {
    }
    %125 = vector.broadcast %6 : vector<1x128xf32> to vector<8x128xf32>
    %126 = arith.mulf %125, %95 : vector<8x128xf32>
    %127 = arith.addf %3, %126 : vector<8x128xf32>
    %128 = vector.broadcast %8 : vector<1x128xf32> to vector<8x128xf32>
    %129 = arith.mulf %128, %97 : vector<8x128xf32>
    %130 = arith.addf %127, %129 : vector<8x128xf32>
    %c0_73 = arith.constant 0 : index
    %c0_74 = arith.constant 0 : index
    %131 = vector.load %arg30[%c0_73, %c0_74] : memref<8x128xf32, #tpu.memory_space<vmem>>, vector<8x128xf32>
    tpu.vector_store %arg30[%c0_73, %c0_74], %130 {strides = array<i32>} : memref<8x128xf32, #tpu.memory_space<vmem>>, vector<8x128xf32>,
    %c0_75 = arith.constant 0 : index
    %c0_76 = arith.constant 0 : index
    %c0_77 = arith.constant 0 : index
    %132 = vector.load %arg29[%c0_75, %c0_76, %c0_77] : memref<1x8x128xf32, #tpu.memory_space<vmem>>, vector<1x8x128xf32>
    %133 = vector.shape_cast %132 : vector<1x8x128xf32> to vector<8x128xf32>
    %134 = vector.shape_cast %130 : vector<8x128xf32> to vector<1x8x128xf32>
    tpu.vector_store %arg29[%c0_75, %c0_76, %c0_77], %134 {strides = array<i32>} : memref<1x8x128xf32, #tpu.memory_space<vmem>>, vector<1x8x128xf32>,
    %c6_i32 = arith.constant 6 : i32
    %135 = arith.cmpi eq, %arg0, %c6_i32 : i32
    %136 = arith.extui %135 : i1 to i32
    %c0_i32_78 = arith.constant 0 : i32
    %137 = arith.cmpi ne, %136, %c0_i32_78 : i32
    scf.if %137 {
      %c0_79 = arith.constant 0 : index
      %c0_80 = arith.constant 0 : index
      %138 = vector.load %arg31[%c0_79, %c0_80] : memref<8x128xf32, #tpu.memory_space<vmem>>, vector<8x128xf32>
      %c0_81 = arith.constant 0 : index
      %c0_82 = arith.constant 0 : index
      %139 = vector.load %arg27[%c0_81, %c0_82] : memref<8x128xf32, #tpu.memory_space<vmem>>, vector<8x128xf32>
      tpu.vector_store %arg27[%c0_81, %c0_82], %138 {strides = array<i32>} : memref<8x128xf32, #tpu.memory_space<vmem>>, vector<8x128xf32>,
      %c0_83 = arith.constant 0 : index
      %c0_84 = arith.constant 0 : index
      %140 = vector.load %arg28[%c0_83, %c0_84] : memref<8x128xf32, #tpu.memory_space<vmem>>, vector<8x128xf32>
      tpu.vector_store %arg28[%c0_83, %c0_84], %130 {strides = array<i32>} : memref<8x128xf32, #tpu.memory_space<vmem>>, vector<8x128xf32>,
    } else {
    }
    return
  }
  func.func @transform_0(%arg0: i32) -> (i32, i32) {
    %c0_i32 = arith.constant 0 : i32
    %c0_i32_0 = arith.constant 0 : i32
    %c0_i32_1 = arith.constant 0 : i32
    return %c0_i32, %c0_i32_0 : i32, i32
  }
  func.func @transform_1(%arg0: i32) -> (i32, i32, i32) {
    %c0_i32 = arith.constant 0 : i32
    %c0_i32_0 = arith.constant 0 : i32
    %c0_i32_1 = arith.constant 0 : i32
    return %arg0, %c0_i32, %c0_i32_0 : i32, i32, i32
  }
  func.func @transform_2(%arg0: i32) -> (i32, i32, i32) {
    %c0_i32 = arith.constant 0 : i32
    %c0_i32_0 = arith.constant 0 : i32
    %c0_i32_1 = arith.constant 0 : i32
    return %arg0, %c0_i32, %c0_i32_0 : i32, i32, i32
  }
  func.func @transform_3(%arg0: i32) -> (i32, i32, i32) {
    %c0_i32 = arith.constant 0 : i32
    %c0_i32_0 = arith.constant 0 : i32
    %c0_i32_1 = arith.constant 0 : i32
    return %arg0, %c0_i32, %c0_i32_0 : i32, i32, i32
  }
  func.func @transform_4(%arg0: i32) -> (i32, i32, i32) {
    %c0_i32 = arith.constant 0 : i32
    %c0_i32_0 = arith.constant 0 : i32
    %c0_i32_1 = arith.constant 0 : i32
    return %arg0, %c0_i32, %c0_i32_0 : i32, i32, i32
  }
  func.func @transform_5(%arg0: i32) -> (i32, i32, i32) {
    %c0_i32 = arith.constant 0 : i32
    %c0_i32_0 = arith.constant 0 : i32
    %c0_i32_1 = arith.constant 0 : i32
    return %arg0, %c0_i32, %c0_i32_0 : i32, i32, i32
  }
  func.func @transform_6(%arg0: i32) -> (i32, i32, i32) {
    %c0_i32 = arith.constant 0 : i32
    %c0_i32_0 = arith.constant 0 : i32
    %c0_i32_1 = arith.constant 0 : i32
    return %arg0, %c0_i32, %c0_i32_0 : i32, i32, i32
  }
  func.func @transform_7(%arg0: i32) -> (i32, i32, i32) {
    %c0_i32 = arith.constant 0 : i32
    %c0_i32_0 = arith.constant 0 : i32
    %c0_i32_1 = arith.constant 0 : i32
    return %arg0, %c0_i32, %c0_i32_0 : i32, i32, i32
  }
  func.func @transform_8(%arg0: i32) -> (i32, i32, i32) {
    %c0_i32 = arith.constant 0 : i32
    %c0_i32_0 = arith.constant 0 : i32
    %c0_i32_1 = arith.constant 0 : i32
    return %arg0, %c0_i32, %c0_i32_0 : i32, i32, i32
  }
  func.func @transform_9(%arg0: i32) -> (i32, i32, i32) {
    %c0_i32 = arith.constant 0 : i32
    %c0_i32_0 = arith.constant 0 : i32
    %c0_i32_1 = arith.constant 0 : i32
    return %arg0, %c0_i32, %c0_i32_0 : i32, i32, i32
  }
  func.func @transform_10(%arg0: i32) -> (i32, i32, i32) {
    %c0_i32 = arith.constant 0 : i32
    %c0_i32_0 = arith.constant 0 : i32
    %c0_i32_1 = arith.constant 0 : i32
    return %arg0, %c0_i32, %c0_i32_0 : i32, i32, i32
  }
  func.func @transform_11(%arg0: i32) -> (i32, i32, i32) {
    %c0_i32 = arith.constant 0 : i32
    %c0_i32_0 = arith.constant 0 : i32
    %c0_i32_1 = arith.constant 0 : i32
    return %arg0, %c0_i32, %c0_i32_0 : i32, i32, i32
  }
  func.func @transform_12(%arg0: i32) -> (i32, i32, i32) {
    %c0_i32 = arith.constant 0 : i32
    %c0_i32_0 = arith.constant 0 : i32
    %c0_i32_1 = arith.constant 0 : i32
    return %arg0, %c0_i32, %c0_i32_0 : i32, i32, i32
  }
  func.func @transform_13(%arg0: i32) -> (i32, i32) {
    %c0_i32 = arith.constant 0 : i32
    %c0_i32_0 = arith.constant 0 : i32
    %c0_i32_1 = arith.constant 0 : i32
    return %c0_i32, %c0_i32_0 : i32, i32
  }
  func.func @transform_14(%arg0: i32) -> (i32, i32, i32) {
    %c0_i32 = arith.constant 0 : i32
    %c0_i32_0 = arith.constant 0 : i32
    %c0_i32_1 = arith.constant 0 : i32
    return %arg0, %c0_i32, %c0_i32_0 : i32, i32, i32
  }
  func.func @transform_15(%arg0: i32) -> (i32, i32) {
    %c0_i32 = arith.constant 0 : i32
    %c0_i32_0 = arith.constant 0 : i32
    %c0_i32_1 = arith.constant 0 : i32
    return %c0_i32, %c0_i32_0 : i32, i32
  }
  func.func @transform_16(%arg0: i32) -> (i32, i32) {
    %c0_i32 = arith.constant 0 : i32
    %c0_i32_0 = arith.constant 0 : i32
    %c0_i32_1 = arith.constant 0 : i32
    return %c0_i32, %c0_i32_0 : i32, i32
  }
  func.func @transform_17(%arg0: i32) -> (i32, i32) {
    %c0_i32 = arith.constant 0 : i32
    %c0_i32_0 = arith.constant 0 : i32
    %c0_i32_1 = arith.constant 0 : i32
    return %c0_i32, %c0_i32_0 : i32, i32
  }
  func.func @transform_18(%arg0: i32) -> (i32, i32) {
    %c0_i32 = arith.constant 0 : i32
    %c0_i32_0 = arith.constant 0 : i32
    %c0_i32_1 = arith.constant 0 : i32
    return %c0_i32, %c0_i32_0 : i32, i32
  }
  func.func @transform_19(%arg0: i32) -> (i32, i32) {
    %c0_i32 = arith.constant 0 : i32
    %c0_i32_0 = arith.constant 0 : i32
    %c0_i32_1 = arith.constant 0 : i32
    return %c0_i32, %c0_i32_0 : i32, i32
  }
  func.func @transform_20(%arg0: i32) -> (i32, i32) {
    %c0_i32 = arith.constant 0 : i32
    %c0_i32_0 = arith.constant 0 : i32
    %c0_i32_1 = arith.constant 0 : i32
    return %c0_i32, %c0_i32_0 : i32, i32
  }
  func.func @transform_21(%arg0: i32) -> (i32, i32) {
    %c0_i32 = arith.constant 0 : i32
    %c0_i32_0 = arith.constant 0 : i32
    %c0_i32_1 = arith.constant 0 : i32
    return %c0_i32, %c0_i32_0 : i32, i32
  }
  func.func @transform_22(%arg0: i32) -> (i32, i32) {
    %c0_i32 = arith.constant 0 : i32
    %c0_i32_0 = arith.constant 0 : i32
    %c0_i32_1 = arith.constant 0 : i32
    return %c0_i32, %c0_i32_0 : i32, i32
  }
  func.func @transform_23(%arg0: i32) -> (i32, i32) {
    %c0_i32 = arith.constant 0 : i32
    %c0_i32_0 = arith.constant 0 : i32
    %c0_i32_1 = arith.constant 0 : i32
    return %c0_i32, %c0_i32_0 : i32, i32
  }
  func.func @transform_24(%arg0: i32) -> (i32, i32) {
    %c0_i32 = arith.constant 0 : i32
    %c0_i32_0 = arith.constant 0 : i32
    %c0_i32_1 = arith.constant 0 : i32
    return %c0_i32, %c0_i32_0 : i32, i32
  }
  func.func @transform_25(%arg0: i32) -> (i32, i32) {
    %c0_i32 = arith.constant 0 : i32
    %c0_i32_0 = arith.constant 0 : i32
    %c0_i32_1 = arith.constant 0 : i32
    return %c0_i32, %c0_i32_0 : i32, i32
  }
  func.func @transform_26(%arg0: i32) -> (i32, i32) {
    %c0_i32 = arith.constant 0 : i32
    %c0_i32_0 = arith.constant 0 : i32
    %c0_i32_1 = arith.constant 0 : i32
    return %c0_i32, %c0_i32_0 : i32, i32
  }
  func.func @transform_27(%arg0: i32) -> (i32, i32) {
    %c0_i32 = arith.constant 0 : i32
    %c0_i32_0 = arith.constant 0 : i32
    %c0_i32_1 = arith.constant 0 : i32
    return %c0_i32, %c0_i32_0 : i32, i32
  }
  func.func @transform_28(%arg0: i32) -> (i32, i32, i32) {
    %c0_i32 = arith.constant 0 : i32
    %c0_i32_0 = arith.constant 0 : i32
    %c0_i32_1 = arith.constant 0 : i32
    return %arg0, %c0_i32, %c0_i32_0 : i32, i32, i32
  }
}

</mosaic_0001>

<bundles_post_ra>
// kernel: tpu_custom_call.1
= control target key start
LH: loop header
LB: loop body
LE: loop exit
PB: predicated region body
PF: predicated region fallthrough
CT: control target
= control target key end

     0   :  { %s4655_s0 = inlined_call_operand.hbm [shape: f32[8,128], index: 0, kind: input, shape index: {}]   ;;  %s4656_s1 = inlined_call_operand.hbm [shape: f32[7,1,128], index: 1, kind: input, shape index: {}]   ;;  %s4657_s2 = inlined_call_operand.hbm [shape: f32[7,1,128], index: 2, kind: input, shape index: {}]   ;;  %s4658_s3 = inlined_call_operand.hbm [shape: f32[7,1,128], index: 3, kind: input, shape index: {}]   ;;  %s4659_s4 = inlined_call_operand.hbm [shape: f32[7,8,128], index: 4, kind: input, shape index: {}]   ;;  %s4660_s5 = inlined_call_operand.hbm [shape: bf16[7,128,128], index: 5, kind: input, shape index: {}]   ;;  %s4661_s6 = inlined_call_operand.hbm [shape: f32[7,1,128], index: 6, kind: input, shape index: {}]   ;;  %s4662_s7 = inlined_call_operand.hbm [shape: f32[7,1,128], index: 7, kind: input, shape index: {}]   ;;  %s4663_s8 = inlined_call_operand.hbm [shape: bf16[7,128,128], index: 8, kind: input, shape index: {}]   ;;  %s4664_s9 = inlined_call_operand.vmem [shape: f32[7,1,128], index: 9, kind: input, shape index: {}]   ;;  %s4665_s10 = inlined_call_operand.hbm [shape: f32[7,1,128], index: 10, kind: input, shape index: {}]   ;;  %s4666_s11 = inlined_call_operand.hbm [shape: bf16[7,128,128], index: 11, kind: input, shape index: {}]   ;;  %s4667_s12 = inlined_call_operand.hbm [shape: f32[7,1,128], index: 12, kind: input, shape index: {}]   ;;  %s4668_s13 = inlined_call_operand.hbm [shape: bf16[128,128], index: 13, kind: input, shape index: {}]   ;;  %s4669_s14 = inlined_call_operand.hbm [shape: f32[7,1,128], index: 14, kind: input, shape index: {}]   ;;  %s4670_s15 = inlined_call_operand.hbm [shape: bf16[128,128], index: 15, kind: input, shape index: {}]   ;;  %s4671_s16 = inlined_call_operand.vmem [shape: f32[1,128], index: 16, kind: input, shape index: {}]   ;;  %s4672_s17 = inlined_call_operand.hbm [shape: bf16[128,128], index: 17, kind: input, shape index: {}]   ;;  %s4673_s18 = inlined_call_operand.vmem [shape: f32[1,128], index: 18, kind: input, shape index: {}]   ;;  %s4674_s19 = inlined_call_operand.vmem [shape: f32[1,128], index: 19, kind: input, shape index: {}]   ;;  %s4675_s20 = inlined_call_operand.hbm [shape: bf16[128,128], index: 20, kind: input, shape index: {}]   ;;  %s4676_s21 = inlined_call_operand.vmem [shape: f32[1,128], index: 21, kind: input, shape index: {}]   ;;  %s4677_s22 = inlined_call_operand.vmem [shape: f32[1,128], index: 22, kind: input, shape index: {}]   ;;  %s4678_s23 = inlined_call_operand.hbm [shape: bf16[128,128], index: 23, kind: input, shape index: {}]   ;;  %s4679_s24 = inlined_call_operand.vmem [shape: f32[1,128], index: 24, kind: input, shape index: {}]   ;;  %s4680_s25 = inlined_call_operand.vmem [shape: f32[1,128], index: 25, kind: input, shape index: {}]   ;;  %s4681_s26 = inlined_call_operand.hbm [shape: f32[8,128], index: 26, kind: output, shape index: {0}]   ;;  %s4682_s27 = inlined_call_operand.hbm [shape: f32[8,128], index: 27, kind: output, shape index: {1}]   ;;  %s4683_s28 = inlined_call_operand.hbm [shape: f32[7,8,128], index: 28, kind: output, shape index: {2}]  }
   0x1   :  { %4721 = sst [smem:[#allocation57_spill]] %s4655_s0 }
   0x2   :  { %4722 = sst [smem:[#allocation58_spill]] %s4656_s1 }
   0x3   :  { %4723 = sst [smem:[#allocation59_spill]] %s4657_s2 }
   0x4   :  { %4724 = sst [smem:[#allocation60_spill]] %s4658_s3 }
   0x5   :  { %4725 = sst [smem:[#allocation61_spill]] %s4659_s4 }
   0x6   :  { %4726 = sst [smem:[#allocation62_spill]] %s4660_s5 }
   0x7   :  { %4727 = sst [smem:[#allocation63_spill]] %s4661_s6 }
   0x8   :  { %4728 = sst [smem:[#allocation64_spill]] %s4662_s7 }
   0x9   :  { %4729 = sst [smem:[#allocation65_spill]] %s4663_s8 }
   0xa   :  { %4730 = sst [smem:[#allocation66_spill]] %s4664_s9 }
   0xb   :  { %4731 = sst [smem:[#allocation67_spill]] %s4665_s10 }
   0xc   :  { %4732 = sst [smem:[#allocation68_spill]] %s4666_s11 }
   0xd   :  { %4733 = sst [smem:[#allocation69_spill]] %s4667_s12 }
   0xe   :  { %4734 = sst [smem:[#allocation70_spill]] %s4668_s13 }
   0xf   :  { %4735 = sst [smem:[#allocation71_spill]] %s4670_s15 }
  0x10   :  { %4736 = sst [smem:[#allocation72_spill]] %s4672_s17 }
  0x11   :  { %4737 = sst [smem:[#allocation73_spill]] %s4675_s20 }
  0x12   :  { %4738 = sst [smem:[#allocation74_spill]] %s4676_s21 }
  0x13   :  { %4739 = sst [smem:[#allocation75_spill]] %s4677_s22 }
  0x14   :  { %4740 = sst [smem:[#allocation76_spill]] %s4678_s23 }
  0x15   :  { %4741 = sst [smem:[#allocation77_spill]] %s4679_s24 }
  0x16   :  { %4742 = sst [smem:[#allocation78_spill]] %s4680_s25 }
  0x17   :  { %4743 = sst [smem:[#allocation79_spill]] %s4681_s26 }
  0x18   :  { %4744 = sst [smem:[#allocation80_spill]] %s4682_s27 }
  0x19   :  { %4745 = sst [smem:[#allocation81_spill]] %s4683_s28 }
  0x1a   :  { %34 = vsyncpa [#allocation5], 0 }
  0x1b   :  { %35 = vsyncpa [#allocation8], 0 }
  0x1c   :  { %37 = vsyncpa [#allocation8 + $0x1], 0 }
  0x1d   :  { %38 = vsyncpa [#allocation11], 0 }
  0x1e   :  { %40 = vsyncpa [#allocation11 + $0x1], 0 }
  0x1f   :  { %41 = vsyncpa [#allocation14], 0 }
  0x20   :  { %43 = vsyncpa [#allocation14 + $0x1], 0 }
  0x21   :  { %44 = vsyncpa [#allocation17], 0 }
  0x22   :  { %46 = vsyncpa [#allocation17 + $0x1], 0 }
  0x23   :  { %47 = vsyncpa [#allocation20], 0 }
  0x24   :  { %49 = vsyncpa [#allocation20 + $0x1], 0 }
  0x25   :  { %50 = vsyncpa [#allocation23], 0 }
  0x26   :  { %52 = vsyncpa [#allocation23 + $0x1], 0 }
  0x27   :  { %53 = vsyncpa [#allocation26], 0 }
  0x28   :  { %55 = vsyncpa [#allocation26 + $0x1], 0 }
  0x29   :  { %56 = vsyncpa [#allocation29], 0 }
  0x2a   :  { %57 = vsyncpa [#allocation32], 0 }
  0x2b   :  { %58 = vsyncpa [#allocation6], 0 }
  0x2c   :  { %59 = vsyncpa [#allocation35], 0  ;;  %s4053_s8 = smov 0   ;;  %s4055_s5 = smov 0  }
  0x2d   :  { %s4057_s9 = smov 0   ;;  %s4059_s30 = smov 0  }
  0x2e LB: > { %4746 = sst [smem:[#allocation52_spill]] %s3890_s9  ;;  %s4072_s3 = sadd.s32 4294967295, %s3894_s30   ;;  %s3894_s30 = sphi %s4059_s30, %s4799_s30   ;;  %s3890_s9 = sphi %s4057_s9, %s4801_s9   ;;  %s3886_s5 = sphi %s4055_s5, %s4803_s5   ;;  %s3882_s8 = sphi %s4053_s8, %s4802_s8  }
  0x2f   : > { %s4695_s6 = sadd.s32 4294967294, %s3894_s30   ;;  %s4076_s10 = sadd.s32 1, %s3894_s30  }
  0x30   : > { %4747 = sst [smem:[#allocation53_spill]] %s4076_s10  ;;  %s93_s0 = sadd.s32 1, %s3890_s9 }
  0x31   : > { %s90_s11 = ssub.s32 %s3894_s30, %s4076_s10  ;;  %p100_p0 = scmp.ne.s32.totalorder %s3890_s9, %s3886_s5 }
  0x32   : > { %p91_p1 = scmp.eq.s32.totalorder %s90_s11, 0  ;;  %p101_p2 = scmp.eq.s32.totalorder %s3894_s30, 0 }
  0x33   : > { %p106_p3 = scmp.ne.s32.totalorder %s3886_s5, %s3882_s8  ;;  %p107_p4 = scmp.eq.s32.totalorder %s4072_s3, 0 }
  0x34   : > { %s4087_s29 = scalar_select %p91_p1, %s3890_s9, %s93_s0  }
  0x35   : > { %p4089_p5 = por %p101_p2, %p100_p0  ;;  %p4095_p6 = por %p107_p4, %p106_p3 }
  0x36   : > { %4748 = sst [smem:[#allocation54_spill]] %s4087_s29  ;;  %p4702_p7 = scmp.eq.s32.totalorder %s4072_s3, 6 }
  0x37   : > { %p742_p8 = scmp.eq.s32.totalorder %s4695_s6, 6  ;;  %p2681_p9 = scmp.ge.s32.totalorder %s3894_s30, 1 }
  0x38   : > { %p749_p10 = scmp.lt.s32.totalorder %s3894_s30, 8  ;;  %p4106_p11 = por %p4702_p7, %p100_p0 }
  0x39   : > { %p4110_p12 = por %p742_p8, %p106_p3  ;;  %p2682_p1 = scmp.ne.s32.totalorder %s4072_s3, 0 }
  0x3a   : > { %s4751_s12 = scalar_select %p4106_p11, 1, 0 }
  0x3b   : > { %s4753_s1 = scalar_select %p4110_p12, 1, 0 }
  0x3c   : > { %4752 = sst [smem:[#allocation55_spill]] %s4751_s12  ;;  %p4114_p13 = pnand %p2681_p9, %p749_p10 }
  0x3d   : > { %4754 = sst [smem:[#allocation56_spill]] %s4753_s1  ;;  %s3896_s29 = smov [#allocation28]  }
  0x3e   : > { %p3105_p2 = pneg %p4114_p13  ;;  %s4756_s17 = sld [smem:[#allocation72_spill]] }
  0x3f   : > { %s805_s10 = sshll.u32 %s3896_s29, 4  ;;  %s4758_s12 = sld [smem:[#allocation57_spill]]  ;;  %s806_s10 = int_to_ptr.vmem [resolvable:$true] %s805_s10 }
  0x40   : > { %p4126_p0 = pnand %p3105_p2, %p107_p4  ;;  %s3897_s26 = smov 64  }
  0x41   : > { %s3898_s8 = smov 4   ;;  %s4759_s13 = sld [smem:[#allocation70_spill]] }
  0x42   : > { %s3899_s24 = smov [#allocation4]   ;;  %s3900_s28 = smov [#allocation24]  }
  0x43   : > { %s763_s29 = sshll.u32 %s3899_s24, 4  ;;  %s4760_s15 = sld [smem:[#allocation71_spill]]  ;;  %s764_s29 = int_to_ptr.vmem [resolvable:$true] %s763_s29 }
  0x44   : > { %s803_s11 = sshll.u32 %s4756_s17, 4  ;;  %s4761_s20 = sld [smem:[#allocation73_spill]]  ;;  %s804_s11 = int_to_ptr.hbm [resolvable:$true] %s803_s11 }
  0x45   : > { %s761_s27 = sshll.u32 %s4758_s12, 4  ;;  %s774_s12 = sshll.u32 %s3900_s28, 4  ;;  %s762_s27 = int_to_ptr.hbm [resolvable:$true] %s761_s27  ;;  %s775_s12 = int_to_ptr.vmem [resolvable:$true] %s774_s12 }
  0x46   : > { %3117 = dma.hbm_to_vmem [thread:$0]  (!%p4126_p0), %s804_s11, 1024, %s806_s10, [#allocation29], %s3897_s26, %s3897_s26, %s3898_s8  }
  0x47   : > { %s772_s25 = sshll.u32 %s4759_s13, 4  ;;  %s3902_s22 = smov [#allocation30]   ;;  %s773_s25 = int_to_ptr.hbm [resolvable:$true] %s772_s25 }
  0x48   : > { %3108 = dma.hbm_to_vmem [thread:$0]  (!%p4126_p0), %s762_s27, 128, %s764_s29, [#allocation5]  }
  0x49   : > { %s786_s21 = sshll.u32 %s4760_s15, 4  ;;  %s3901_s27 = smov [#allocation27]   ;;  %s787_s21 = int_to_ptr.hbm [resolvable:$true] %s786_s21 }
  0x4a   : > { %3111 = dma.hbm_to_vmem [thread:$0]  (!%p4126_p0), %s773_s25, 1024, %s775_s12, [#allocation23], %s3897_s26, %s3897_s26, %s3898_s8  }
  0x4b   : > { %s823_s10 = sshll.u32 %s4761_s20, 4  ;;  %s788_s11 = sshll.u32 %s3901_s27, 4  ;;  %s824_s10 = int_to_ptr.hbm [resolvable:$true] %s823_s10  ;;  %s789_s11 = int_to_ptr.vmem [resolvable:$true] %s788_s11 }
  0x4c   : > { %3114 = dma.hbm_to_vmem [thread:$0]  (!%p4126_p0), %s787_s21, 1024, %s789_s11, [#allocation26], %s3897_s26, %s3897_s26, %s3898_s8  }
  0x4d   : > { %s825_s0 = sshll.u32 %s3902_s22, 4  ;;  %s4762_s23 = sld [smem:[#allocation76_spill]]  ;;  %s826_s0 = int_to_ptr.vmem [resolvable:$true] %s825_s0 }
  0x4e   : > { %3120 = dma.hbm_to_vmem [thread:$0]  (!%p4126_p0), %s824_s10, 1024, %s826_s0, [#allocation29], %s3897_s26, %s3897_s26, %s3898_s8  }
  0x4f   : > { %s3903_s12 = smov [#allocation31]   ;;  %p2688_p3 = scmp.ge.s32.totalorder %s3894_s30, 7 }
  0x50   : > { %s845_s1 = sshll.u32 %s3903_s12, 4  ;;  %s4174_s21 = sand.u32 (!%p2688_p3), 1, %s3894_s30   ;;  %s846_s1 = int_to_ptr.vmem [resolvable:$true] %s845_s1 }
  0x51   : > { %861 = sbr.rel (%p2688_p3) target bundleno = 316 (0x13c), region = 68  ;;  %s4177_s17 = sand.u32 (!%p2688_p3), 1, %s3890_s9  }
  0x52   : > { %s4763_s27 = sld [smem:[#allocation58_spill]] (!%p2688_p3)  ;;  %s868_s11 = scalar_lea.vmem (!%p2688_p3), [#allocation7], %s4177_s17 }
  0x53   : > { %s843_s25 = sshll.u32 %s4762_s23, 4  ;;  %s875_s22 = sshll.u32 (!%p2688_p3), %s868_s11, 4  ;;  %s844_s25 = int_to_ptr.hbm [resolvable:$true] %s843_s25  ;;  %s876_s22 = int_to_ptr.vmem [resolvable:$true] %s875_s22 }
  0x54   : > { %3123 = dma.hbm_to_vmem [thread:$0]  (!%p4126_p0), %s844_s25, 1024, %s846_s1, [#allocation32], %s3897_s26, %s3897_s26, %s3898_s8  }
  0x55   : > { %s4703_s8 = scalar_lea.sflag (!%p2688_p3), [#allocation8], %s4174_s21 }
  0x58   : > { %s871_s6 = scalar_lea.hbm %s4763_s27, %s3894_s30  ;;  %s3390_s12 = scalar_lea.hbm %s4763_s27, 7 }
  0x59   : > { %s873_s26 = sshll.u32 %s871_s6, 4  ;;  %s874_s26 = int_to_ptr.hbm [resolvable:$true] %s873_s26 }
  0x5a   : > { %s3384_s0 = sshra.s32 %s874_s26, 4  ;;  %s3385_s0 = int_to_ptr.hbm [resolvable:$true] %s3384_s0 }
  0x5b   : > { %s3386_s29 = scalar_lea.hbm %s3385_s0, 1  ;;  %p3391_p2 = scmp.lt.s32.totalorder %s3385_s0, %s4763_s27 }
  0x5c   : > { %p3387_p8 = scmp.ne.s32.totalorder %s3385_s0, %s3386_s29  ;;  %p3392_p0 = scmp.lt.s32.totalorder %s3390_s12, %s3386_s29 }
  0x5e   : > { %p3388_p9 = pnand %p3387_p8, %p4089_p5  ;;  %p3393_p3 = por %p3392_p0, %p3391_p2 }
  0x60   : > { %p3389_p10 = pneg %p3388_p9 }
  0x62   : > { %p3394_p7 = pnand %p3393_p3, %p3389_p10 }
  0x64   : > { %3397 = shalt.err (!%p3394_p7)
}
  0x65   : > { %3059 = dma.hbm_to_vmem [thread:$0]  (%p4089_p5), %s874_s26, 16, %s876_s22, %s4703_s8  }
  0x66   : > { %s4764_s11 = sld [smem:[#allocation60_spill]]  ;;  %s902_s1 = scalar_lea.vmem [#allocation10], %s4177_s17 }
  0x67   : > { %s909_s0 = sshll.u32 %s902_s1, 4  ;;  %s4705_s29 = scalar_lea.sflag [#allocation11], %s4174_s21  ;;  %s910_s0 = int_to_ptr.vmem [resolvable:$true] %s909_s0 }
  0x6c   : > { %s905_s28 = scalar_lea.hbm %s4764_s11, %s3894_s30  ;;  %s3418_s22 = scalar_lea.hbm %s4764_s11, 7 }
  0x6d   : > { %s907_s25 = sshll.u32 %s905_s28, 4  ;;  %s908_s25 = int_to_ptr.hbm [resolvable:$true] %s907_s25 }
  0x6e   : > { %s3412_s12 = sshra.s32 %s908_s25, 4  ;;  %s3413_s12 = int_to_ptr.hbm [resolvable:$true] %s3412_s12 }
  0x6f   : > { %s3414_s24 = scalar_lea.hbm %s3413_s12, 1  ;;  %p3419_p10 = scmp.lt.s32.totalorder %s3413_s12, %s4764_s11 }
  0x70   : > { %p3415_p7 = scmp.ne.s32.totalorder %s3413_s12, %s3414_s24  ;;  %p3420_p2 = scmp.lt.s32.totalorder %s3418_s22, %s3414_s24 }
  0x72   : > { %p3416_p8 = pnand %p3415_p7, %p4089_p5  ;;  %p3421_p0 = por %p3420_p2, %p3419_p10 }
  0x74   : > { %p3417_p9 = pneg %p3416_p8 }
  0x76   : > { %p3422_p3 = pnand %p3421_p0, %p3417_p9 }
  0x78   : > { %3425 = shalt.err (!%p3422_p3)
}
  0x79   : > { %3061 = dma.hbm_to_vmem [thread:$0]  (%p4089_p5), %s908_s25, 16, %s910_s0, %s4705_s29  }
  0x7a   : > { %s4216_s6 = sshll.u32 %s4177_s17, 6  ;;  %s4219_s13 = sshll.u32 %s3894_s30, 6 }
  0x7b   : > { %s4765_s1 = sld [smem:[#allocation62_spill]]  ;;  %s939_s24 = scalar_lea.vmem [#allocation13], %s4216_s6 }
  0x7c   : > { %s947_s22 = sshll.u32 %s939_s24, 4  ;;  %s4714_s10 = scalar_lea.sflag [#allocation14], %s4174_s21  ;;  %s948_s22 = int_to_ptr.vmem [resolvable:$true] %s947_s22 }
  0x81   : > { %s944_s12 = scalar_lea.hbm %s4765_s1, %s4219_s13  ;;  %s3446_s29 = scalar_lea.hbm %s4765_s1, 448 }
  0x82   : > { %s945_s26 = sshll.u32 %s944_s12, 4  ;;  %s946_s26 = int_to_ptr.hbm [resolvable:$true] %s945_s26 }
  0x83   : > { %s3440_s8 = sshra.s32 %s946_s26, 4  ;;  %s3441_s8 = int_to_ptr.hbm [resolvable:$true] %s3440_s8 }
  0x84   : > { %s3442_s11 = scalar_lea.hbm %s3441_s8, 64  ;;  %p3447_p10 = scmp.lt.s32.totalorder %s3441_s8, %s4765_s1 }
  0x85   : > { %p3443_p7 = scmp.ne.s32.totalorder %s3441_s8, %s3442_s11  ;;  %p3448_p2 = scmp.lt.s32.totalorder %s3446_s29, %s3442_s11 }
  0x87   : > { %p3444_p8 = pnand %p3443_p7, %p4089_p5  ;;  %p3449_p0 = por %p3448_p2, %p3447_p10 }
  0x89   : > { %p3445_p9 = pneg %p3444_p8 }
  0x8b   : > { %p3450_p3 = pnand %p3449_p0, %p3445_p9 }
  0x8d   : > { %3453 = shalt.err (!%p3450_p3)
}
  0x8e   : > { %s4709_s28 = smov 64   ;;  %s4711_s12 = smov 4  }
  0x8f   : > { %3063 = dma.hbm_to_vmem [thread:$0]  (%p4089_p5), %s946_s26, 1024, %s948_s22, %s4714_s10, %s4709_s28, %s4709_s28, %s4711_s12  }
  0x90   : > { %s4766_s11 = sld [smem:[#allocation64_spill]]  ;;  %s977_s25 = scalar_lea.vmem [#allocation16], %s4177_s17 }
  0x91   : > { %s984_s0 = sshll.u32 %s977_s25, 4  ;;  %s4713_s15 = scalar_lea.sflag [#allocation17], %s4174_s21  ;;  %s985_s0 = int_to_ptr.vmem [resolvable:$true] %s984_s0 }
  0x96   : > { %s980_s29 = scalar_lea.hbm %s4766_s11, %s3894_s30  ;;  %s3474_s22 = scalar_lea.hbm %s4766_s11, 7 }
  0x97   : > { %s982_s24 = sshll.u32 %s980_s29, 4  ;;  %s983_s24 = int_to_ptr.hbm [resolvable:$true] %s982_s24 }
  0x98   : > { %s3468_s1 = sshra.s32 %s983_s24, 4  ;;  %s3469_s1 = int_to_ptr.hbm [resolvable:$true] %s3468_s1 }
  0x99   : > { %s3470_s23 = scalar_lea.hbm %s3469_s1, 1  ;;  %p3475_p10 = scmp.lt.s32.totalorder %s3469_s1, %s4766_s11 }
  0x9a   : > { %p3471_p7 = scmp.ne.s32.totalorder %s3469_s1, %s3470_s23  ;;  %p3476_p2 = scmp.lt.s32.totalorder %s3474_s22, %s3470_s23 }
  0x9c   : > { %p3472_p8 = pnand %p3471_p7, %p4089_p5  ;;  %p3477_p0 = por %p3476_p2, %p3475_p10 }
  0x9e   : > { %p3473_p9 = pneg %p3472_p8 }
  0xa0   : > { %p3478_p3 = pnand %p3477_p0, %p3473_p9 }
  0xa2   : > { %3481 = shalt.err (!%p3478_p3)
}
  0xa3   : > { %3065 = dma.hbm_to_vmem [thread:$0]  (%p4089_p5), %s983_s24, 16, %s985_s0, %s4713_s15  }
  0xa4   : > { %s4767_s27 = sld [smem:[#allocation67_spill]]  ;;  %s1022_s25 = scalar_lea.vmem [#allocation19], %s4177_s17 }
  0xa5   : > { %s1029_s26 = sshll.u32 %s1022_s25, 4  ;;  %s4715_s23 = scalar_lea.sflag [#allocation20], %s4174_s21  ;;  %s1030_s26 = int_to_ptr.vmem [resolvable:$true] %s1029_s26 }
  0xaa   : > { %s1025_s29 = scalar_lea.hbm %s4767_s27, %s3894_s30  ;;  %s3502_s24 = scalar_lea.hbm %s4767_s27, 7 }
  0xab   : > { %s1027_s1 = sshll.u32 %s1025_s29, 4  ;;  %s1028_s1 = int_to_ptr.hbm [resolvable:$true] %s1027_s1 }
  0xac   : > { %s3496_s22 = sshra.s32 %s1028_s1, 4  ;;  %s3497_s22 = int_to_ptr.hbm [resolvable:$true] %s3496_s22 }
  0xad   : > { %s3498_s20 = scalar_lea.hbm %s3497_s22, 1  ;;  %p3503_p10 = scmp.lt.s32.totalorder %s3497_s22, %s4767_s27 }
  0xae   : > { %p3499_p7 = scmp.ne.s32.totalorder %s3497_s22, %s3498_s20  ;;  %p3504_p2 = scmp.lt.s32.totalorder %s3502_s24, %s3498_s20 }
  0xb0   : > { %p3500_p8 = pnand %p3499_p7, %p4089_p5  ;;  %p3505_p0 = por %p3504_p2, %p3503_p10 }
  0xb2   : > { %p3501_p9 = pneg %p3500_p8 }
  0xb4   : > { %p3506_p3 = pnand %p3505_p0, %p3501_p9 }
  0xb6   : > { %3509 = shalt.err (!%p3506_p3)
}
  0xb7   : > { %3067 = dma.hbm_to_vmem [thread:$0]  (%p4089_p5), %s1028_s1, 16, %s1030_s26, %s4715_s23  }
  0xb8   : > { %s4768_s12 = sld [smem:[#allocation59_spill]]  ;;  %s885_s25 = scalar_lea.vmem [#allocation9], %s4177_s17 }
  0xb9   : > { %s892_s0 = sshll.u32 %s885_s25, 4  ;;  %s2689_s20 = sshll.u32 %s4177_s17, 3  ;;  %s893_s0 = int_to_ptr.vmem [resolvable:$true] %s892_s0 }
  0xbe   : > { %s888_s29 = scalar_lea.hbm %s4768_s12, %s3894_s30  ;;  %s3530_s26 = scalar_lea.hbm %s4768_s12, 7 }
  0xbf   : > { %s890_s22 = sshll.u32 %s888_s29, 4  ;;  %s891_s22 = int_to_ptr.hbm [resolvable:$true] %s890_s22 }
  0xc0   : > { %s3524_s24 = sshra.s32 %s891_s22, 4  ;;  %s3525_s24 = int_to_ptr.hbm [resolvable:$true] %s3524_s24 }
  0xc1   : > { %s3526_s8 = scalar_lea.hbm %s3525_s24, 1  ;;  %p3531_p10 = scmp.lt.s32.totalorder %s3525_s24, %s4768_s12 }
  0xc2   : > { %p3527_p7 = scmp.ne.s32.totalorder %s3525_s24, %s3526_s8  ;;  %p3532_p2 = scmp.lt.s32.totalorder %s3530_s26, %s3526_s8 }
  0xc4   : > { %p3528_p8 = pnand %p3527_p7, %p4089_p5  ;;  %p3533_p0 = por %p3532_p2, %p3531_p10 }
  0xc6   : > { %p3529_p9 = pneg %p3528_p8 }
  0xc8   : > { %p3534_p3 = pnand %p3533_p0, %p3529_p9 }
  0xca   : > { %3537 = shalt.err (!%p3534_p3)
}
  0xcb   : > { %s4769_s28 = scalar_lea.sflag [#allocation8], %s4174_s21  ;;  %s2690_s29 = sshll.u32 %s3894_s30, 3 }
  0xcc   : > { %3060 = dma.hbm_to_vmem [thread:$0]  (%p4089_p5), %s891_s22, 16, %s893_s0, %s4769_s28  }
  0xcd   : > { %s4770_s10 = sld [smem:[#allocation61_spill]]  ;;  %s920_s11 = scalar_lea.vmem [#allocation12], %s2689_s20 }
  0xce   : > { %s928_s27 = sshll.u32 %s920_s11, 4  ;;  %s929_s27 = int_to_ptr.vmem [resolvable:$true] %s928_s27 }
  0xd3   : > { %s924_s15 = scalar_lea.hbm %s4770_s10, %s2690_s29  ;;  %s3558_s0 = scalar_lea.hbm %s4770_s10, 56 }
  0xd4   : > { %s926_s1 = sshll.u32 %s924_s15, 4  ;;  %s927_s1 = int_to_ptr.hbm [resolvable:$true] %s926_s1 }
  0xd5   : > { %s3552_s24 = sshra.s32 %s927_s1, 4  ;;  %s3553_s24 = int_to_ptr.hbm [resolvable:$true] %s3552_s24 }
  0xd6   : > { %s3554_s8 = scalar_lea.hbm %s3553_s24, 8  ;;  %p3559_p10 = scmp.lt.s32.totalorder %s3553_s24, %s4770_s10 }
  0xd7   : > { %p3555_p7 = scmp.ne.s32.totalorder %s3553_s24, %s3554_s8  ;;  %p3560_p2 = scmp.lt.s32.totalorder %s3558_s0, %s3554_s8 }
  0xd9   : > { %p3556_p8 = pnand %p3555_p7, %p4089_p5  ;;  %p3561_p0 = por %p3560_p2, %p3559_p10 }
  0xdb   : > { %p3557_p9 = pneg %p3556_p8 }
  0xdd   : > { %p3562_p3 = pnand %p3561_p0, %p3557_p9 }
  0xdf   : > { %3565 = shalt.err (!%p3562_p3)
}
  0xe0   : > { %s4771_s11 = scalar_lea.sflag [#allocation11], %s4174_s21  ;;  %s4772_s29 = sld [smem:[#allocation63_spill]] }
  0xe1   : > { %3062 = dma.hbm_to_vmem [thread:$0]  (%p4089_p5), %s927_s1, 128, %s929_s27, %s4771_s11  }
  0xe2   : > { %s960_s15 = scalar_lea.vmem [#allocation15], %s4177_s17 }
  0xe3   : > { %s967_s26 = sshll.u32 %s960_s15, 4  ;;  %s968_s26 = int_to_ptr.vmem [resolvable:$true] %s967_s26 }
  0xe6   : > { %s963_s25 = scalar_lea.hbm %s4772_s29, %s3894_s30  ;;  %s3586_s27 = scalar_lea.hbm %s4772_s29, 7 }
  0xe7   : > { %s965_s9 = sshll.u32 %s963_s25, 4  ;;  %s966_s9 = int_to_ptr.hbm [resolvable:$true] %s965_s9 }
  0xe8   : > { %s3580_s24 = sshra.s32 %s966_s9, 4  ;;  %s3581_s24 = int_to_ptr.hbm [resolvable:$true] %s3580_s24 }
  0xe9   : > { %s3582_s8 = scalar_lea.hbm %s3581_s24, 1  ;;  %p3587_p10 = scmp.lt.s32.totalorder %s3581_s24, %s4772_s29 }
  0xea   : > { %p3583_p7 = scmp.ne.s32.totalorder %s3581_s24, %s3582_s8  ;;  %p3588_p2 = scmp.lt.s32.totalorder %s3586_s27, %s3582_s8 }
  0xec   : > { %p3584_p8 = pnand %p3583_p7, %p4089_p5  ;;  %p3589_p0 = por %p3588_p2, %p3587_p10 }
  0xee   : > { %p3585_p9 = pneg %p3584_p8 }
  0xf0   : > { %p3590_p3 = pnand %p3589_p0, %p3585_p9 }
  0xf2   : > { %3593 = shalt.err (!%p3590_p3)
}
  0xf3   : > { %s4773_s11 = scalar_lea.sflag [#allocation14], %s4174_s21  ;;  %s4774_s25 = sld [smem:[#allocation65_spill]] }
  0xf4   : > { %3064 = dma.hbm_to_vmem [thread:$0]  (%p4089_p5), %s966_s9, 16, %s968_s26, %s4773_s11  }
  0xf5   : > { %s995_s0 = scalar_lea.vmem [#allocation18], %s4216_s6 }
  0xf6   : > { %s1003_s22 = sshll.u32 %s995_s0, 4  ;;  %s1004_s22 = int_to_ptr.vmem [resolvable:$true] %s1003_s22 }
  0xf9   : > { %s1000_s15 = scalar_lea.hbm %s4774_s25, %s4219_s13  ;;  %s3614_s26 = scalar_lea.hbm %s4774_s25, 448 }
  0xfa   : > { %s1001_s1 = sshll.u32 %s1000_s15, 4  ;;  %s1002_s1 = int_to_ptr.hbm [resolvable:$true] %s1001_s1 }
  0xfb   : > { %s3608_s24 = sshra.s32 %s1002_s1, 4  ;;  %s3609_s24 = int_to_ptr.hbm [resolvable:$true] %s3608_s24 }
  0xfc   : > { %s3610_s8 = scalar_lea.hbm %s3609_s24, 64  ;;  %p3615_p10 = scmp.lt.s32.totalorder %s3609_s24, %s4774_s25 }
  0xfd   : > { %p3611_p7 = scmp.ne.s32.totalorder %s3609_s24, %s3610_s8  ;;  %p3616_p2 = scmp.lt.s32.totalorder %s3614_s26, %s3610_s8 }
  0xff   : > { %p3612_p8 = pnand %p3611_p7, %p4089_p5  ;;  %p3617_p0 = por %p3616_p2, %p3615_p10 }
 0x101   : > { %p3613_p9 = pneg %p3612_p8 }
 0x103   : > { %p3618_p3 = pnand %p3617_p0, %p3613_p9 }
 0x105   : > { %3621 = shalt.err (!%p3618_p3)
}
 0x106   : > { %s4775_s23 = smov 4   ;;  %s4776_s20 = smov 64  }
 0x107   : > { %s4777_s15 = scalar_lea.sflag [#allocation17], %s4174_s21  ;;  %s4778_s28 = sld [smem:[#allocation68_spill]] }
 0x108   : > { %3066 = dma.hbm_to_vmem [thread:$0]  (%p4089_p5), %s1002_s1, 1024, %s1004_s22, %s4777_s15, %s4776_s20, %s4776_s20, %s4775_s23  }
 0x109   : > { %s1040_s24 = scalar_lea.vmem [#allocation21], %s4216_s6 }
 0x10a   : > { %s1048_s8 = sshll.u32 %s1040_s24, 4  ;;  %s1049_s8 = int_to_ptr.vmem [resolvable:$true] %s1048_s8 }
 0x10d   : > { %s1045_s9 = scalar_lea.hbm %s4778_s28, %s4219_s13  ;;  %s3642_s22 = scalar_lea.hbm %s4778_s28, 448 }
 0x10e   : > { %s1046_s26 = sshll.u32 %s1045_s9, 4  ;;  %s1047_s26 = int_to_ptr.hbm [resolvable:$true] %s1046_s26 }
 0x10f   : > { %s3636_s11 = sshra.s32 %s1047_s26, 4  ;;  %s3637_s11 = int_to_ptr.hbm [resolvable:$true] %s3636_s11 }
 0x110   : > { %s3638_s10 = scalar_lea.hbm %s3637_s11, 64  ;;  %p3643_p10 = scmp.lt.s32.totalorder %s3637_s11, %s4778_s28 }
 0x111   : > { %p3639_p7 = scmp.ne.s32.totalorder %s3637_s11, %s3638_s10  ;;  %p3644_p2 = scmp.lt.s32.totalorder %s3642_s22, %s3638_s10 }
 0x113   : > { %p3640_p8 = pnand %p3639_p7, %p4089_p5  ;;  %p3645_p0 = por %p3644_p2, %p3643_p10 }
 0x115   : > { %p3641_p9 = pneg %p3640_p8 }
 0x117   : > { %p3646_p3 = pnand %p3645_p0, %p3641_p9 }
 0x119   : > { %3649 = shalt.err (!%p3646_p3)
}
 0x11a   : > { %s4779_s6 = scalar_lea.sflag [#allocation20], %s4174_s21  ;;  %s4780_s25 = sld [smem:[#allocation69_spill]] }
 0x11b   : > { %3068 = dma.hbm_to_vmem [thread:$0]  (%p4089_p5), %s1047_s26, 1024, %s1049_s8, %s4779_s6, %s4776_s20, %s4776_s20, %s4775_s23  }
 0x11c   : > { %s1061_s27 = scalar_lea.vmem [#allocation22], %s4177_s17  ;;  %s1059_s24 = scalar_lea.sflag [#allocation23], %s4174_s21 }
 0x11d   : > { %s1068_s9 = sshll.u32 %s1061_s27, 4  ;;  %s1069_s9 = int_to_ptr.vmem [resolvable:$true] %s1068_s9 }
 0x120   : > { %s1064_s0 = scalar_lea.hbm %s4780_s25, %s3894_s30  ;;  %s3670_s23 = scalar_lea.hbm %s4780_s25, 7 }
 0x121   : > { %s1066_s10 = sshll.u32 %s1064_s0, 4  ;;  %s1067_s10 = int_to_ptr.hbm [resolvable:$true] %s1066_s10 }
 0x122   : > { %s3664_s11 = sshra.s32 %s1067_s10, 4  ;;  %s3665_s11 = int_to_ptr.hbm [resolvable:$true] %s3664_s11 }
 0x123   : > { %s3666_s22 = scalar_lea.hbm %s3665_s11, 1  ;;  %p3671_p10 = scmp.lt.s32.totalorder %s3665_s11, %s4780_s25 }
 0x124   : > { %p3667_p7 = scmp.ne.s32.totalorder %s3665_s11, %s3666_s22  ;;  %p3672_p2 = scmp.lt.s32.totalorder %s3670_s23, %s3666_s22 }
 0x126   : > { %p3668_p8 = pnand %p3667_p7, %p4089_p5  ;;  %p3673_p0 = por %p3672_p2, %p3671_p10 }
 0x128   : > { %p3669_p9 = pneg %p3668_p8 }
 0x12a   : > { %p3674_p3 = pnand %p3673_p0, %p3669_p9 }
 0x12c   : > { %3677 = shalt.err (!%p3674_p3)
}
 0x12d   : > { %3069 = dma.hbm_to_vmem [thread:$0]  (%p4089_p5), %s1067_s10, 16, %s1069_s9, %s1059_s24  }
 0x12e   : > { %s1081_s13 = scalar_lea.hbm %s4669_s14, %s3894_s30  ;;  %s1078_s12 = scalar_lea.vmem [#allocation25], %s4177_s17 }
 0x12f   : > { %s1085_s0 = sshll.u32 %s1078_s12, 4  ;;  %s1083_s27 = sshll.u32 %s1081_s13, 4  ;;  %s1086_s0 = int_to_ptr.vmem [resolvable:$true] %s1085_s0  ;;  %s1084_s27 = int_to_ptr.hbm [resolvable:$true] %s1083_s27 }
 0x130   : > { %s1076_s11 = scalar_lea.sflag [#allocation26], %s4174_s21  ;;  %s3692_s22 = sshra.s32 %s1084_s27, 4  ;;  %s3693_s22 = int_to_ptr.hbm [resolvable:$true] %s3692_s22 }
 0x131   : > { %s3694_s1 = scalar_lea.hbm %s3693_s22, 1  ;;  %s3698_s10 = scalar_lea.hbm %s4669_s14, 7 }
 0x132   : > { %p3695_p7 = scmp.ne.s32.totalorder %s3693_s22, %s3694_s1  ;;  %p3699_p10 = scmp.lt.s32.totalorder %s3693_s22, %s4669_s14 }
 0x133   : > { %p3700_p2 = scmp.lt.s32.totalorder %s3698_s10, %s3694_s1 }
 0x134   : > { %p3696_p8 = pnand %p3695_p7, %p4089_p5 }
 0x135   : > { %p3701_p0 = por %p3700_p2, %p3699_p10 }
 0x136   : > { %p3697_p9 = pneg %p3696_p8 }
 0x138   : > { %p3702_p3 = pnand %p3701_p0, %p3697_p9 }
 0x13a   : > { %3705 = shalt.err (!%p3702_p3)
}
 0x13b   : > { %3070 = dma.hbm_to_vmem [thread:$0]  (%p4089_p5), %s1084_s27, 16, %s1086_s0, %s1076_s11  }
 0x13c PF: > { %1094 = sbr.rel (%p4114_p13) target bundleno = 1648 (0x670), region = 124 }
 0x141   : > { %3821 = dma.done.wait (%p107_p4), [#allocation5], 128  }
 0x142   : > { %3823 = vsyncadd (%p107_p4), [#allocation5], 4294967168  ;;  %s4408_s21 = sand.u32 1, %s4072_s3   ;;  %s4411_s17 = sand.u32 1, %s3886_s5  }
 0x143   : > { %s1102_s2 = scalar_lea.sflag [#allocation8], %s4408_s21  ;;  %s1104_s20 = scalar_lea.vmem [#allocation7], %s4411_s17 }
 0x144   : > { %3825 = dma.done.wait (%p4095_p6), %s1102_s2, 32  }
 0x145   : > { %3827 = vsyncadd (%p4095_p6), %s1102_s2, 4294967264  ;;  %s1113_s4 = scalar_lea.vmem [#allocation9], %s4411_s17  ;;  %s1120_s8 = scalar_lea.sflag [#allocation11], %s4408_s21 }
 0x146   : > { %s1122_s26 = scalar_lea.vmem [#allocation10], %s4411_s17 }
 0x147   : > { %3829 = dma.done.wait (%p4095_p6), %s1120_s8, 144  }
 0x148   : > { %3831 = vsyncadd (%p4095_p6), %s1120_s8, 4294967152  ;;  %s2702_s6 = sshll.u32 %s4411_s17, 3  ;;  %s2703_s13 = sshll.u32 %s4411_s17, 6 }
 0x149   : > { %s4430_s12 = scalar_lea.vmem [#allocation12], %s2702_s6  ;;  %s1139_s0 = scalar_lea.sflag [#allocation14], %s4408_s21 }
 0x14a   : > { %s4433_s27 = scalar_lea.vmem [#allocation13], %s2703_s13 }
 0x14b   : > { %3833 = dma.done.wait (%p4095_p6), %s1139_s0, 1040  }
 0x14c   : > { %3835 = vsyncadd (%p4095_p6), %s1139_s0, 4294966256  ;;  %s1151_s11 = scalar_lea.vmem [#allocation15], %s4411_s17  ;;  %s1158_s22 = scalar_lea.sflag [#allocation17], %s4408_s21 }
 0x14d   : > { %s1160_s1 = scalar_lea.vmem [#allocation16], %s4411_s17 }
 0x14e   : > { %3837 = dma.done.wait (%p4095_p6), %s1158_s22, 1040  }
 0x14f   : > { %3839 = vsyncadd (%p4095_p6), %s1158_s22, 4294966256  ;;  %s4446_s15 = scalar_lea.vmem [#allocation18], %s2703_s13  ;;  %s1177_s23 = scalar_lea.sflag [#allocation20], %s4408_s21 }
 0x150   : > { %s1179_s10 = scalar_lea.vmem [#allocation19], %s4411_s17 }
 0x151   : > { %3841 = dma.done.wait (%p4095_p6), %s1177_s23, 1040  }
 0x152   : > { %3843 = vsyncadd (%p4095_p6), %s1177_s23, 4294966256  ;;  %s4454_s9 = scalar_lea.vmem [#allocation21], %s2703_s13  ;;  %s1196_s24 = scalar_lea.sflag [#allocation23], %s4408_s21 }
 0x153   : > { %s1198_s2 = scalar_lea.vmem [#allocation22], %s4411_s17 }
 0x154   : > { %3845 = dma.done.wait (%p4095_p6), %s1196_s24, 16  }
 0x155   : > { %3847 = vsyncadd (%p4095_p6), %s1196_s24, 4294967280 }
 0x156   : > { %3849 = dma.done.wait (%p107_p4), [#allocation23], 1024  }
 0x157   : > { %3851 = vsyncadd (%p107_p4), [#allocation23], 4294966272  ;;  %s1210_s8 = scalar_lea.sflag [#allocation26], %s4408_s21  ;;  %s1212_s0 = scalar_lea.vmem [#allocation25], %s4411_s17 }
 0x158   : > { %3853 = dma.done.wait (%p4095_p6), %s1210_s8, 16  }
 0x159   : > { %3855 = vsyncadd (%p4095_p6), %s1210_s8, 4294967280 }
 0x15a   : > { %3857 = dma.done.wait (%p107_p4), [#allocation26], 1024  }
 0x15b   : > { %3859 = vsyncadd (%p107_p4), [#allocation26], 4294966272 }
 0x15c   : > { %3861 = dma.done.wait (%p107_p4), [#allocation29], 2048  }
 0x15d   : > { %3863 = vsyncadd (%p107_p4), [#allocation29], 4294965248 }
 0x15e   : > { %3865 = dma.done.wait (%p107_p4), [#allocation32], 1024  }
 0x15f   : > { %3867 = vsyncadd (%p107_p4), [#allocation32], 4294966272  ;;  %p1356_p5 = scmp.lt.s32.totalorder %s4072_s3, 6  ;;  %s4781_s23 = sld [smem:[#allocation66_spill]] }
 0x160   : > { %s4494_s8 = scalar_lea.vmem [#allocation36], %s2702_s6 }
 0x161   : > { %s4486_s7 = scalar_select %p1356_p5, %s4072_s3, 6 }
 0x162   : > { %1362 = sbr.rel (%p2682_p1) target bundleno = 361 (0x169), region = 200 }
 0x165   : > { %s1358_s24 = scalar_lea.vmem %s4781_s23, %s4486_s7 }
 0x167   : > { %v1363_v0 = vld [vmem:[#allocation4] sm:$0xff] }
 0x168   : > { %1364 = vst [vmem:[#allocation2] sm:$0xff] %v1363_v0 }
 0x169 PF: > { %v2990_v1 = vld [vmem:[%s4433_s27 + $0x38] sm:$0xff]  ;;  %v2989_v2 = vld [vmem:[%s4433_s27 + $0x30] sm:$0xff]  ;;  %v2988_v3 = vld [vmem:[%s4433_s27 + $0x28] sm:$0xff]  ;;  %s4784_s7 = sld [smem:[#allocation75_spill]] (!%p2682_p1) }
 0x16a   : > { %1433 = vmatpush.bf16.msra.mxu0 %v2990_v1  ;;  %v2987_v4 = vld [vmem:[%s4433_s27 + $0x20] sm:$0xff]  ;;  %v2986_v5 = vld [vmem:[%s4433_s27 + $0x18] sm:$0xff]  ;;  %v2985_v6 = vld [vmem:[%s4433_s27 + $0x10] sm:$0xff]  ;;  %s4785_s23 = sld [smem:[#allocation77_spill]] (!%p2682_p1) }
 0x16b   : > { %v2984_v7 = vld [vmem:[%s4433_s27 + $0x8] sm:$0xff]  ;;  %v2983_v8 = vld [vmem:[%s4433_s27] sm:$0xff]  ;;  %v3005_v12 = vld [vmem:[%s4446_s15 + $0x30] sm:$0xff]  ;;  %s4786_s27 = sld [smem:[#allocation78_spill]] (!%p2682_p1) }
 0x16c   : > { %v3006_v11 = vld [vmem:[%s4446_s15 + $0x38] sm:$0xff]  ;;  %v3004_v13 = vld [vmem:[%s4446_s15 + $0x28] sm:$0xff]  ;;  %v3003_v14 = vld [vmem:[%s4446_s15 + $0x20] sm:$0xff] }
 0x16d   : > { %1636 = vmatpush.bf16.msra.mxu2 %v3006_v11  ;;  %v3002_v15 = vld [vmem:[%s4446_s15 + $0x18] sm:$0xff]  ;;  %v3001_v19 = vld [vmem:[%s4446_s15 + $0x10] sm:$0xff]  ;;  %v3000_v24 = vld [vmem:[%s4446_s15 + $0x8] sm:$0xff] }
 0x16e   : > { %1434 = vmatpush.bf16.msra.mxu0 %v2989_v2  ;;  %v2999_v30 = vld [vmem:[%s4446_s15] sm:$0xff]  ;;  %v2997_v41 = vld [vmem:[#allocation24 + $0x30] sm:$0xff]  ;;  %v2996_v43 = vld [vmem:[#allocation24 + $0x28] sm:$0xff] }
 0x16f   : > { %v4506_v9 = vld [vmem:[#allocation2] sm:$0xff]  ;;  %v2998_v40 = vld [vmem:[#allocation24 + $0x38] sm:$0xff]  ;;  %v2995_v46 = vld [vmem:[#allocation24 + $0x20] sm:$0xff] }
 0x170   : > { %v4510_v10 = vpack.c.bf16 %v4506_v9, %v4506_v9  ;;  %1557 = vmatpush.bf16.msra.mxu1 %v2998_v40  ;;  %v2994_v49 = vld [vmem:[#allocation24 + $0x18] sm:$0xff]  ;;  %v1446_v50 = vld [vmem:[%s1151_s11] sm:$0x1]  ;;  %v2993_v54 = vld [vmem:[#allocation24 + $0x10] sm:$0xff] }
 0x171   : > { %1637 = vmatpush.bf16.msra.mxu2 %v3005_v12  ;;  %v1447_v55 = vld [vmem:[%s1160_s1] sm:$0x1]  ;;  %v2991_v63 = vld [vmem:[#allocation24] sm:$0xff] }
 0x172   : > { %1435 = vmatpush.bf16.msra.mxu0 %v2988_v3  ;;  %v2992_v59 = vld [vmem:[#allocation24 + $0x8] sm:$0xff]  ;;  %v3022_v2 = vld [vmem:[#allocation27 + $0x38] sm:$0xff] }
 0x173   : > { %v3014_v3 = vld [vmem:[%s4454_s9 + $0x38] sm:$0xff]  ;;  %v3011_v11 = vld [vmem:[%s4454_s9 + $0x20] sm:$0xff] }
 0x174   : > { %1558 = vmatpush.bf16.msra.mxu1 %v2997_v41  ;;  %1761 = vmatpush.bf16.msra.mxu3 %v3014_v3  ;;  %v3189_v3 = vld [vmem:[%s1122_s26] ss:$0 sm:$0xff] }
 0x175   : > { %1638 = vmatpush.bf16.msra.mxu2 %v3004_v13  ;;  %v3018_v13 = vld [vmem:[#allocation27 + $0x18] sm:$0xff] }
 0x176   : > { %1436 = vmatpush.bf16.msra.mxu0 %v2987_v4  ;;  %v3021_v4 = vld [vmem:[#allocation27 + $0x30] sm:$0xff] }
 0x178   : > { %1559 = vmatpush.bf16.msra.mxu1 %v2996_v43 }
 0x179   : > { %1639 = vmatpush.bf16.msra.mxu2 %v3003_v14  ;;  %v3010_v14 = vld [vmem:[%s4454_s9 + $0x18] sm:$0xff] }
 0x17a   : > { %1437 = vmatpush.bf16.msra.mxu0 %v2986_v5  ;;  %v3013_v5 = vld [vmem:[%s4454_s9 + $0x30] sm:$0xff] }
 0x17b   : > { %1762 = vmatpush.bf16.msra.mxu3 %v3013_v5  ;;  %v4550_v5 = vld [vmem:[%s1104_s20] sm:$0x1] }
 0x17c   : > { %1560 = vmatpush.bf16.msra.mxu1 %v2995_v46 }
 0x17d   : > { %1640 = vmatpush.bf16.msra.mxu2 %v3002_v15 }
 0x17e   : > { %1438 = vmatpush.bf16.msra.mxu0 %v2985_v6  ;;  %v3020_v6 = vld [vmem:[#allocation27 + $0x28] sm:$0xff] }
 0x180   : > { %1561 = vmatpush.bf16.msra.mxu1 %v2994_v49 }
 0x181   : > { %1641 = vmatpush.bf16.msra.mxu2 %v3001_v19  ;;  %v3017_v19 = vld [vmem:[#allocation27 + $0x10] sm:$0xff] }
 0x182   : > { %1439 = vmatpush.bf16.msra.mxu0 %v2984_v7  ;;  %v3012_v7 = vld [vmem:[%s4454_s9 + $0x28] sm:$0xff] }
 0x183   : > { %1763 = vmatpush.bf16.msra.mxu3 %v3012_v7 }
 0x184   : > { %1562 = vmatpush.bf16.msra.mxu1 %v2993_v54 }
 0x185   : > { %1642 = vmatpush.bf16.msra.mxu2 %v3000_v24 }
 0x186   : > { %1440 = vmatpush.bf16.msra.mxu0 %v2983_v8  ;;  %v3019_v8 = vld [vmem:[#allocation27 + $0x20] sm:$0xff] }
 0x187   : > { %1764 = vmatpush.bf16.msra.mxu3 %v3011_v11  ;;  %v1862_v11 = vmul.f32 -0.5, %v4550_v5 }
 0x188   : > { %1563 = vmatpush.bf16.msra.mxu1 %v2992_v59 }
 0x189   : > { %1441 = vmatmul.bf16.vlgmr.msra.gmra.mxu0 %v4510_v10  ;;  %1643 = vmatpush.bf16.msra.mxu2 %v2999_v30 }
 0x18a   : > { %1843 = vmatpush.bf16.msrb.mxu0 %v3022_v2 }
 0x18b   : > { %1765 = vmatpush.bf16.msra.mxu3 %v3010_v14 }
 0x18c   : > { %1564 = vmatpush.bf16.msra.mxu1 %v2991_v63 }
 0x18e   : > { %1844 = vmatpush.bf16.msrb.mxu0 %v3021_v4  ;;  %v3191_v4 = vld [vmem:[%s4671_s16] ss:$0 sm:$0xff] }
 0x18f   : > { %1565 = vmatmul.bf16.vlgmr.msra.gmra.mxu1 %v4510_v10 }
 0x192   : > { %1845 = vmatpush.bf16.msrb.mxu0 %v3020_v6  ;;  %v1861_v6 = vsub.f32 %v4506_v9, %v3189_v3 }
 0x196   : > { %1846 = vmatpush.bf16.msrb.mxu0 %v3019_v8  ;;  %v1868_v8 = vmul.f32 0.5, %v4550_v5 }
 0x198   : > { %v1871_v14 = vperm.slane %v1868_v8, 0 }
 0x19a   : > { %1847 = vmatpush.bf16.msrb.mxu0 %v3018_v13 }
 0x19e   : > { %1848 = vmatpush.bf16.msrb.mxu0 %v3017_v19 }
 0x206   : > { %v1442_v16 = vpop.f32.mrf.mxu0 }
 0x207   : > { %v1448_v17 = vrot.slane %v1442_v16, 4  ;;  %v1454_v18 = vmul.f32 %v1442_v16, %v1442_v16 }
 0x209   : > { %v1449_v20 = vadd.f32 %v1448_v17, %v1442_v16  ;;  %v1455_v21 = vrot.slane %v1454_v18, 4 }
 0x20b   : > { %v1450_v22 = vrot.slane %v1449_v20, 2  ;;  %v1456_v23 = vadd.f32 %v1455_v21, %v1454_v18 }
 0x20c   : > { %v1566_v12 = vpop.f32.mrf.mxu1 }
 0x20d   : > { %v1451_v25 = vadd.f32 %v1450_v22, %v1449_v20  ;;  %v1457_v26 = vrot.slane %v1456_v23, 2  ;;  %v3009_v20 = vld [vmem:[%s4454_s9 + $0x10] sm:$0xff] }
 0x20e   : > { %v1444_v27 = vpop.f32.mrf.mxu0  ;;  %1766 = vmatpush.bf16.msra.mxu3 %v3009_v20  ;;  %v4562_v20 = vld [vmem:[%s4430_s12] sm:$0xff] }
 0x20f   : > { %v1452_v28 = vrot.slane %v1451_v25, 1  ;;  %v1458_v29 = vadd.f32 %v1457_v26, %v1456_v23  ;;  %v3016_v27 = vld [vmem:[#allocation27 + $0x8] sm:$0xff] }
 0x210   : > { %1849 = vmatpush.bf16.msrb.mxu0 %v3016_v27 }
 0x211   : > { %v1459_v31 = vrot.slane %v1458_v29, 1  ;;  %v1453_v32 = vadd.f32 %v1452_v28, %v1451_v25  ;;  %v3008_v28 = vld [vmem:[%s4454_s9 + $0x8] sm:$0xff] }
 0x212   : > { %1767 = vmatpush.bf16.msra.mxu3 %v3008_v28 }
 0x213   : > { %v1460_v33 = vadd.f32 %v1459_v31, %v1458_v29  ;;  %v1461_v34 = vmul.f32 0.125, %v1453_v32 }
 0x214   : > { %v1568_v23 = vpop.f32.mrf.mxu1 }
 0x215   : > { %v1462_v35 = vmul.f32 0.125, %v1460_v33  ;;  %v1463_v36 = vmul.f32 %v1461_v34, %v1461_v34 }
 0x217   : > { %v1464_v37 = vsub.f32 %v1462_v35, %v1463_v36  ;;  %v3015_v35 = vld [vmem:[#allocation27] sm:$0xff] }
 0x218   : > { %v3007_v36 = vld [vmem:[%s4454_s9] sm:$0xff]  ;;  %1850 = vmatpush.bf16.msrb.mxu0 %v3015_v35  ;;  %s4783_s9 = sld [smem:[#allocation74_spill]] (!%p2682_p1) }
 0x219   : > { %v1465_v38 = vmax.f32 %v1464_v37, 0.0  ;;  %1768 = vmatpush.bf16.msra.mxu3 %v3007_v36 }
 0x21b   : > { %v1466_v39 = vadd.f32 1e-05, %v1465_v38 }
 0x21d   : > { %3194 = vrsqrt.f32 %v1466_v39  ;;  %vm1473_vm1 = vweird.f32 %v1466_v39 }
 0x223   : > { %v3195_v42 = vpop.eup %3194 }
 0x224   : > { %v1468_v44 = vmul.f32 %v3195_v42, %v1466_v39  ;;  %vm1474_vm0 = vweird.f32 %v3195_v42 }
 0x225   : > { %vm1475_vm2 = vmor %vm1473_vm1, %vm1474_vm0 }
 0x226   : > { %v1469_v45 = vmul.f32 %v3195_v42, %v1468_v44 }
 0x228   : > { %v1470_v47 = vmul.f32 0.5, %v1469_v45 }
 0x22a   : > { %v1471_v48 = vsub.f32 1.5, %v1470_v47 }
 0x22c   : > { %v1472_v51 = vmul.f32 %v3195_v42, %v1471_v48 }
 0x22e   : > { %v1476_v52 = vsel %vm1475_vm2, %v3195_v42, %v1472_v51 }
 0x22f   : > { %v1477_v53 = vmul.f32 %v1476_v52, %v1446_v50  ;;  %v1649_v52 = vld [vmem:[%s1358_s24] sm:$0x1] }
 0x231   : > { %v1478_v56 = vmul.f32 %v1477_v53, %v1461_v34  ;;  %v1481_v57 = vperm.slane %v1477_v53, 0 }
 0x233   : > { %v1479_v58 = vsub.f32 %v1447_v55, %v1478_v56  ;;  %v1483_v60 = vmul.f32 %v1481_v57, %v1442_v16  ;;  %v3190_v16 = vld [vmem:[%s1212_s0] ss:$0 sm:$0xff] }
 0x234   : > { %v1567_v24 = vadd.f32 %v3190_v16, %v1566_v12  ;;  %v1650_v56 = vld [vmem:[%s1179_s10] sm:$0x1]  ;;  %v1863_v12 = vmul.f32 %v1861_v6, %v1861_v6 }
 0x235   : > { %v1485_v61 = vperm.slane %v1479_v58, 0  ;;  %v3192_v16 = vld [vmem:[%s1198_s2] ss:$0 sm:$0xff] }
 0x236   : > { %v1570_v32 = vmax.f32 %v1567_v24, 0.0 }
 0x237   : > { %v1487_v62 = vadd.f32 %v1485_v61, %v1483_v60 }
 0x238   : > { %v1774_v39 = vpack.c.bf16 %v1570_v32, %v1570_v32 }
 0x239   : > { %v1488_v0 = vmax.f32 %v1487_v62, 0.0 }
 0x23a   : > { %1851 = vmatmul.bf16.vlgmr.msrb.gmra.mxu0 %v1774_v39 }
 0x23b   : > { %v1571_v1 = vpack.c.bf16 %v1488_v0, %v1488_v0 }
 0x23d   : > { %1644 = vmatmul.bf16.vlgmr.msra.gmra.mxu2 %v1571_v1 }
 0x2b7   : > { %v1852_v1 = vpop.f32.mrf.mxu0 }
 0x2b8   : > { %v4553_v7 = vadd.f32 %v3191_v4, %v1852_v1 }
 0x2ba   : > { %v1869_v13 = vmul.f32 %v4553_v7, %v4553_v7 }
 0x2bf   : > { %v1854_v2 = vpop.f32.mrf.mxu0 }
 0x2c0   : > { %v1645_v15 = vpop.f32.mrf.mxu2 }
 0x2c1   : > { %v1651_v17 = vrot.slane %v1645_v15, 4  ;;  %v1657_v18 = vmul.f32 %v1645_v15, %v1645_v15 }
 0x2c3   : > { %v1652_v21 = vadd.f32 %v1651_v17, %v1645_v15  ;;  %v1658_v22 = vrot.slane %v1657_v18, 4  ;;  %v1873_v17 = vmul.f32 %v1871_v14, %v1869_v13 }
 0x2c5   : > { %v1653_v25 = vrot.slane %v1652_v21, 2  ;;  %v1659_v26 = vadd.f32 %v1658_v22, %v1657_v18  ;;  %v4566_v22 = vld [vmem:[%s1113_s4] ss:$0 sm:$0xff] }
 0x2c7   : > { %v1654_v29 = vadd.f32 %v1653_v25, %v1652_v21  ;;  %v1660_v30 = vrot.slane %v1659_v26, 2 }
 0x2c8   : > { %v1647_v31 = vpop.f32.mrf.mxu2 }
 0x2c9   : > { %v1655_v33 = vrot.slane %v1654_v29, 1  ;;  %v1661_v34 = vadd.f32 %v1660_v30, %v1659_v26 }
 0x2cb   : > { %v1662_v37 = vrot.slane %v1661_v34, 1  ;;  %v1656_v38 = vadd.f32 %v1655_v33, %v1654_v29 }
 0x2cd   : > { %v1663_v40 = vadd.f32 %v1662_v37, %v1661_v34  ;;  %v1664_v41 = vmul.f32 0.125, %v1656_v38 }
 0x2cf   : > { %v1665_v42 = vmul.f32 0.125, %v1663_v40  ;;  %v1666_v43 = vmul.f32 %v1664_v41, %v1664_v41 }
 0x2d1   : > { %v1667_v44 = vsub.f32 %v1665_v42, %v1666_v43 }
 0x2d3   : > { %v1668_v45 = vmax.f32 %v1667_v44, 0.0 }
 0x2d5   : > { %v1669_v46 = vadd.f32 1e-05, %v1668_v45 }
 0x2d7   : > { %3196 = vrsqrt.f32 %v1669_v46  ;;  %vm1676_vm4 = vweird.f32 %v1669_v46 }
 0x2dd   : > { %v3197_v47 = vpop.eup %3196 }
 0x2de   : > { %v1671_v48 = vmul.f32 %v3197_v47, %v1669_v46  ;;  %vm1677_vm3 = vweird.f32 %v3197_v47 }
 0x2df   : > { %vm1678_vm5 = vmor %vm1676_vm4, %vm1677_vm3 }
 0x2e0   : > { %v1672_v49 = vmul.f32 %v3197_v47, %v1671_v48 }
 0x2e2   : > { %v1673_v50 = vmul.f32 0.5, %v1672_v49 }
 0x2e4   : > { %v1674_v51 = vsub.f32 1.5, %v1673_v50 }
 0x2e6   : > { %v1675_v53 = vmul.f32 %v3197_v47, %v1674_v51 }
 0x2e8   : > { %v1679_v54 = vsel %vm1678_vm5, %v3197_v47, %v1675_v53 }
 0x2e9   : > { %v1680_v55 = vmul.f32 %v1679_v54, %v1649_v52 }
 0x2eb   : > { %v1681_v57 = vmul.f32 %v1680_v55, %v1664_v41  ;;  %v1684_v58 = vperm.slane %v1680_v55, 0 }
 0x2ed   : > { %v1682_v59 = vsub.f32 %v1650_v56, %v1681_v57  ;;  %v1686_v60 = vmul.f32 %v1684_v58, %v1645_v15  ;;  %v1865_v15 = vperm.slane %v1862_v11, 0 }
 0x2ef   : > { %v1688_v61 = vperm.slane %v1682_v59, 0  ;;  %v1867_v18 = vmul.f32 %v1865_v15, %v1863_v12 }
 0x2f1   : > { %v1690_v62 = vadd.f32 %v1688_v61, %v1686_v60  ;;  %v1874_v24 = vsub.f32 %v1867_v18, %v1873_v17 }
 0x2f3   : > { %v1691_v63 = vmax.f32 %v1690_v62, 0.0 }
 0x2f5   : > { %v1692_v0 = vpack.c.bf16 %v1691_v63, %v1691_v63 }
 0x2f7   : > { %1769 = vmatmul.bf16.vlgmr.msra.gmra.mxu3 %v1692_v0 }
 0x37a   : > { %v1770_v19 = vpop.f32.mrf.mxu3 }
 0x37b   : > { %v1771_v21 = vadd.f32 %v3192_v16, %v1770_v19 }
 0x37d   : > { %v1875_v23 = vmul.f32 %v4562_v20, %v1771_v21 }
 0x37f   : > { %v1879_v25 = vmul.f32 %v4566_v22, %v1875_v23 }
 0x381   : > { %v1880_v26 = vadd.f32 %v1879_v25, %v1874_v24 }
 0x382   : > { %v1772_v27 = vpop.f32.mrf.mxu3 }
 0x383   : > { %1881 = vadd.xlane.f32.xlu0 %v1880_v26 }
 0x3f2   : > { %1885 = sbr.rel (%p2682_p1) target bundleno = 1594 (0x63a), region = 204 }
 0x3f6   : > { %v4570_v28 = vpop.xlane.xlu0 %1881 }
 0x3f7   : > { %v3030_v29 = vld [vmem:[#allocation28 + $0x38] sm:$0xff]  ;;  %v3029_v30 = vld [vmem:[#allocation28 + $0x30] sm:$0xff]  ;;  %v3028_v31 = vld [vmem:[#allocation28 + $0x28] sm:$0xff] }
 0x3f8   : > { %1950 = vmatpush.bf16.msra.mxu0 %v3030_v29  ;;  %v3027_v32 = vld [vmem:[#allocation28 + $0x20] sm:$0xff]  ;;  %v3026_v33 = vld [vmem:[#allocation28 + $0x18] sm:$0xff]  ;;  %v3025_v34 = vld [vmem:[#allocation28 + $0x10] sm:$0xff] }
 0x3f9   : > { %v3024_v35 = vld [vmem:[#allocation28 + $0x8] sm:$0xff]  ;;  %v3023_v36 = vld [vmem:[#allocation28] sm:$0xff]  ;;  %v3038_v37 = vld [vmem:[#allocation30 + $0x38] sm:$0xff] }
 0x3fa   : > { %2071 = vmatpush.bf16.msra.mxu1 %v3038_v37  ;;  %v3037_v38 = vld [vmem:[#allocation30 + $0x30] sm:$0xff]  ;;  %v3036_v39 = vld [vmem:[#allocation30 + $0x28] sm:$0xff]  ;;  %v3035_v40 = vld [vmem:[#allocation30 + $0x20] sm:$0xff] }
 0x3fb   : > { %v3034_v41 = vld [vmem:[#allocation30 + $0x18] sm:$0xff]  ;;  %v3033_v45 = vld [vmem:[#allocation30 + $0x10] sm:$0xff]  ;;  %v3031_v55 = vld [vmem:[#allocation30] sm:$0xff] }
 0x3fc   : > { %1951 = vmatpush.bf16.msra.mxu0 %v3029_v30  ;;  %v1963_v8 = vld [vmem:[%s4673_s18] sm:$0x1]  ;;  %v3046_v25 = vld [vmem:[#allocation31 + $0x38] sm:$0xff]  ;;  %v3045_v26 = vld [vmem:[#allocation31 + $0x30] sm:$0xff] }
 0x3fd   : > { %v1964_v14 = vld [vmem:[%s4674_s19] sm:$0x1]  ;;  %2192 = vmatpush.bf16.msra.mxu2 %v3046_v25  ;;  %v3043_v29 = vld [vmem:[#allocation31 + $0x20] sm:$0xff]  ;;  %v3042_v30 = vld [vmem:[#allocation31 + $0x18] sm:$0xff] }
 0x3fe   : > { %2072 = vmatpush.bf16.msra.mxu1 %v3037_v38  ;;  %v3044_v27 = vld [vmem:[#allocation31 + $0x28] sm:$0xff] }
 0x400   : > { %1952 = vmatpush.bf16.msra.mxu0 %v3028_v31 }
 0x401   : > { %2193 = vmatpush.bf16.msra.mxu2 %v3045_v26 }
 0x402   : > { %2073 = vmatpush.bf16.msra.mxu1 %v3036_v39  ;;  %v3040_v39 = vld [vmem:[#allocation31 + $0x8] sm:$0xff] }
 0x404   : > { %1953 = vmatpush.bf16.msra.mxu0 %v3027_v32 }
 0x405   : > { %2194 = vmatpush.bf16.msra.mxu2 %v3044_v27 }
 0x406   : > { %2074 = vmatpush.bf16.msra.mxu1 %v3035_v40 }
 0x408   : > { %1954 = vmatpush.bf16.msra.mxu0 %v3026_v33 }
 0x409   : > { %2195 = vmatpush.bf16.msra.mxu2 %v3043_v29 }
 0x40a   : > { %2075 = vmatpush.bf16.msra.mxu1 %v3034_v41 }
 0x40c   : > { %1955 = vmatpush.bf16.msra.mxu0 %v3025_v34  ;;  %v3041_v34 = vld [vmem:[#allocation31 + $0x10] sm:$0xff] }
 0x40d   : > { %2196 = vmatpush.bf16.msra.mxu2 %v3042_v30 }
 0x40e   : > { %2076 = vmatpush.bf16.msra.mxu1 %v3033_v45  ;;  %v3039_v45 = vld [vmem:[#allocation31] sm:$0xff] }
 0x410   : > { %1956 = vmatpush.bf16.msra.mxu0 %v3024_v35 }
 0x411   : > { %2197 = vmatpush.bf16.msra.mxu2 %v3041_v34 }
 0x414   : > { %1957 = vmatpush.bf16.msra.mxu0 %v3023_v36 }
 0x415   : > { %2198 = vmatpush.bf16.msra.mxu2 %v3040_v39 }
 0x417   : > { %1958 = vmatmul.bf16.vlgmr.msra.gmra.mxu0 %v4510_v10  ;;  %v3032_v10 = vld [vmem:[#allocation30 + $0x8] sm:$0xff] }
 0x418   : > { %2077 = vmatpush.bf16.msra.mxu1 %v3032_v10 }
 0x419   : > { %2199 = vmatpush.bf16.msra.mxu2 %v3039_v45  ;;  %v2206_v45 = vld [vmem:[%s4786_s27] sm:$0x1] }
 0x41c   : > { %2078 = vmatpush.bf16.msra.mxu1 %v3031_v55 }
 0x494   : > { %v1959_v42 = vpop.f32.mrf.mxu0 }
 0x495   : > { %v1965_v43 = vrot.slane %v1959_v42, 4  ;;  %v1971_v44 = vmul.f32 %v1959_v42, %v1959_v42 }
 0x497   : > { %v1966_v46 = vadd.f32 %v1965_v43, %v1959_v42  ;;  %v1972_v47 = vrot.slane %v1971_v44, 4 }
 0x499   : > { %v1967_v48 = vrot.slane %v1966_v46, 2  ;;  %v1973_v49 = vadd.f32 %v1972_v47, %v1971_v44 }
 0x49b   : > { %v1968_v50 = vadd.f32 %v1967_v48, %v1966_v46  ;;  %v1974_v51 = vrot.slane %v1973_v49, 2 }
 0x49c   : > { %v1961_v52 = vpop.f32.mrf.mxu0 }
 0x49d   : > { %v1969_v53 = vrot.slane %v1968_v50, 1  ;;  %v1975_v54 = vadd.f32 %v1974_v51, %v1973_v49 }
 0x49f   : > { %v1976_v56 = vrot.slane %v1975_v54, 1  ;;  %v1970_v57 = vadd.f32 %v1969_v53, %v1968_v50 }
 0x4a1   : > { %v1977_v58 = vadd.f32 %v1976_v56, %v1975_v54  ;;  %v1978_v59 = vmul.f32 0.125, %v1970_v57 }
 0x4a3   : > { %v1979_v60 = vmul.f32 0.125, %v1977_v58  ;;  %v1980_v61 = vmul.f32 %v1978_v59, %v1978_v59 }
 0x4a5   : > { %v1981_v62 = vsub.f32 %v1979_v60, %v1980_v61 }
 0x4a7   : > { %v1982_v63 = vmax.f32 %v1981_v62, 0.0 }
 0x4a9   : > { %v1983_v0 = vadd.f32 1e-05, %v1982_v63  ;;  %v2085_v63 = vld [vmem:[%s4784_s7] sm:$0x1] }
 0x4ab   : > { %3198 = vrsqrt.f32 %v1983_v0  ;;  %vm1990_vm7 = vweird.f32 %v1983_v0 }
 0x4b1   : > { %v3199_v1 = vpop.eup %3198 }
 0x4b2   : > { %v1985_v2 = vmul.f32 %v3199_v1, %v1983_v0  ;;  %vm1991_vm6 = vweird.f32 %v3199_v1 }
 0x4b3   : > { %vm1992_vm8 = vmor %vm1990_vm7, %vm1991_vm6 }
 0x4b4   : > { %v1986_v3 = vmul.f32 %v3199_v1, %v1985_v2 }
 0x4b6   : > { %v1987_v4 = vmul.f32 0.5, %v1986_v3 }
 0x4b8   : > { %v1988_v6 = vsub.f32 1.5, %v1987_v4 }
 0x4ba   : > { %v1989_v11 = vmul.f32 %v3199_v1, %v1988_v6 }
 0x4bc   : > { %v1993_v12 = vsel %vm1992_vm8, %v3199_v1, %v1989_v11 }
 0x4bd   : > { %v1994_v13 = vmul.f32 %v1993_v12, %v1963_v8 }
 0x4bf   : > { %v1995_v15 = vmul.f32 %v1994_v13, %v1978_v59  ;;  %v1998_v16 = vperm.slane %v1994_v13, 0  ;;  %v2084_v59 = vld [vmem:[%s4783_s9] sm:$0x1] }
 0x4c1   : > { %v1996_v17 = vsub.f32 %v1964_v14, %v1995_v15  ;;  %v2000_v18 = vmul.f32 %v1998_v16, %v1959_v42 }
 0x4c3   : > { %v2002_v19 = vperm.slane %v1996_v17, 0 }
 0x4c5   : > { %v2004_v21 = vadd.f32 %v2002_v19, %v2000_v18 }
 0x4c7   : > { %v2005_v23 = vmax.f32 %v2004_v21, 0.0 }
 0x4c9   : > { %v2006_v24 = vpack.c.bf16 %v2005_v23, %v2005_v23 }
 0x4cb   : > { %2079 = vmatmul.bf16.vlgmr.msra.gmra.mxu1 %v2006_v24 }
 0x548   : > { %v2080_v31 = vpop.f32.mrf.mxu1 }
 0x549   : > { %v2086_v32 = vrot.slane %v2080_v31, 4  ;;  %v2092_v33 = vmul.f32 %v2080_v31, %v2080_v31 }
 0x54b   : > { %v2087_v35 = vadd.f32 %v2086_v32, %v2080_v31  ;;  %v2093_v36 = vrot.slane %v2092_v33, 4 }
 0x54d   : > { %v2088_v37 = vrot.slane %v2087_v35, 2  ;;  %v2094_v38 = vadd.f32 %v2093_v36, %v2092_v33 }
 0x54f   : > { %v2089_v40 = vadd.f32 %v2088_v37, %v2087_v35  ;;  %v2095_v41 = vrot.slane %v2094_v38, 2 }
 0x550   : > { %v2082_v42 = vpop.f32.mrf.mxu1 }
 0x551   : > { %v2090_v43 = vrot.slane %v2089_v40, 1  ;;  %v2096_v44 = vadd.f32 %v2095_v41, %v2094_v38  ;;  %v2205_v41 = vld [vmem:[%s4785_s23] sm:$0x1] }
 0x553   : > { %v2097_v46 = vrot.slane %v2096_v44, 1  ;;  %v2091_v47 = vadd.f32 %v2090_v43, %v2089_v40 }
 0x555   : > { %v2098_v48 = vadd.f32 %v2097_v46, %v2096_v44  ;;  %v2099_v49 = vmul.f32 0.125, %v2091_v47 }
 0x557   : > { %v2100_v10 = vmul.f32 0.125, %v2098_v48  ;;  %v2101_v50 = vmul.f32 %v2099_v49, %v2099_v49 }
 0x559   : > { %v2102_v51 = vsub.f32 %v2100_v10, %v2101_v50 }
 0x55b   : > { %v2103_v52 = vmax.f32 %v2102_v51, 0.0 }
 0x55d   : > { %v2104_v53 = vadd.f32 1e-05, %v2103_v52 }
 0x55f   : > { %3200 = vrsqrt.f32 %v2104_v53  ;;  %vm2111_vm10 = vweird.f32 %v2104_v53 }
 0x565   : > { %v3201_v54 = vpop.eup %3200 }
 0x566   : > { %v2106_v55 = vmul.f32 %v3201_v54, %v2104_v53  ;;  %vm2112_vm9 = vweird.f32 %v3201_v54 }
 0x567   : > { %vm2113_vm11 = vmor %vm2111_vm10, %vm2112_vm9 }
 0x568   : > { %v2107_v56 = vmul.f32 %v3201_v54, %v2106_v55 }
 0x56a   : > { %v2108_v57 = vmul.f32 0.5, %v2107_v56 }
 0x56c   : > { %v2109_v58 = vsub.f32 1.5, %v2108_v57 }
 0x56e   : > { %v2110_v60 = vmul.f32 %v3201_v54, %v2109_v58 }
 0x570   : > { %v2114_v61 = vsel %vm2113_vm11, %v3201_v54, %v2110_v60 }
 0x571   : > { %v2115_v62 = vmul.f32 %v2114_v61, %v2084_v59 }
 0x573   : > { %v2116_v0 = vmul.f32 %v2115_v62, %v2099_v49  ;;  %v2119_v1 = vperm.slane %v2115_v62, 0 }
 0x575   : > { %v2117_v2 = vsub.f32 %v2085_v63, %v2116_v0  ;;  %v2121_v3 = vmul.f32 %v2119_v1, %v2080_v31 }
 0x577   : > { %v2123_v4 = vperm.slane %v2117_v2, 0 }
 0x579   : > { %v2125_v6 = vadd.f32 %v2123_v4, %v2121_v3 }
 0x57b   : > { %v2126_v8 = vmax.f32 %v2125_v6, 0.0 }
 0x57d   : > { %v2127_v11 = vpack.c.bf16 %v2126_v8, %v2126_v8 }
 0x57f   : > { %2200 = vmatmul.bf16.vlgmr.msra.gmra.mxu2 %v2127_v11 }
 0x602   : > { %v2201_v12 = vpop.f32.mrf.mxu2 }
 0x603   : > { %v2207_v13 = vrot.slane %v2201_v12, 4  ;;  %v2213_v14 = vmul.f32 %v2201_v12, %v2201_v12 }
 0x605   : > { %v2208_v15 = vadd.f32 %v2207_v13, %v2201_v12  ;;  %v2214_v16 = vrot.slane %v2213_v14, 4 }
 0x607   : > { %v2209_v17 = vrot.slane %v2208_v15, 2  ;;  %v2215_v18 = vadd.f32 %v2214_v16, %v2213_v14 }
 0x609   : > { %v2210_v19 = vadd.f32 %v2209_v17, %v2208_v15  ;;  %v2216_v21 = vrot.slane %v2215_v18, 2 }
 0x60a   : > { %v2203_v23 = vpop.f32.mrf.mxu2 }
 0x60b   : > { %v2211_v24 = vrot.slane %v2210_v19, 1  ;;  %v2217_v25 = vadd.f32 %v2216_v21, %v2215_v18 }
 0x60d   : > { %v2212_v26 = vadd.f32 %v2211_v24, %v2210_v19  ;;  %v2218_v27 = vrot.slane %v2217_v25, 1 }
 0x60f   : > { %v2219_v29 = vadd.f32 %v2218_v27, %v2217_v25  ;;  %v2220_v30 = vmul.f32 0.125, %v2212_v26 }
 0x611   : > { %v2221_v31 = vmul.f32 0.125, %v2219_v29  ;;  %v2222_v32 = vmul.f32 %v2220_v30, %v2220_v30 }
 0x613   : > { %v2223_v33 = vsub.f32 %v2221_v31, %v2222_v32 }
 0x615   : > { %v2224_v34 = vmax.f32 %v2223_v33, 0.0 }
 0x617   : > { %v2225_v35 = vadd.f32 1e-05, %v2224_v34 }
 0x619   : > { %3202 = vrsqrt.f32 %v2225_v35  ;;  %vm2232_vm13 = vweird.f32 %v2225_v35 }
 0x61f   : > { %v3203_v36 = vpop.eup %3202 }
 0x620   : > { %v2227_v37 = vmul.f32 %v3203_v36, %v2225_v35  ;;  %vm2233_vm12 = vweird.f32 %v3203_v36 }
 0x621   : > { %vm2234_vm14 = vmor %vm2232_vm13, %vm2233_vm12 }
 0x622   : > { %v2228_v38 = vmul.f32 %v3203_v36, %v2227_v37 }
 0x624   : > { %v2229_v39 = vmul.f32 0.5, %v2228_v38 }
 0x626   : > { %v2230_v40 = vsub.f32 1.5, %v2229_v39 }
 0x628   : > { %v2231_v42 = vmul.f32 %v3203_v36, %v2230_v40 }
 0x62a   : > { %v2235_v43 = vsel %vm2234_vm14, %v3203_v36, %v2231_v42 }
 0x62b   : > { %v2236_v44 = vmul.f32 %v2235_v43, %v2205_v41 }
 0x62d   : > { %v2237_v46 = vmul.f32 %v2236_v44, %v2220_v30  ;;  %v2240_v47 = vperm.slane %v2236_v44, 0 }
 0x62f   : > { %v2238_v48 = vsub.f32 %v2206_v45, %v2237_v46  ;;  %v2242_v49 = vmul.f32 %v2240_v47, %v2201_v12 }
 0x631   : > { %v2244_v10 = vperm.slane %v2238_v48, 0 }
 0x633   : > { %v2246_v50 = vadd.f32 %v2244_v10, %v2242_v49 }
 0x635   : > { %v2247_v51 = vmax.f32 %v2246_v50, 0.0 }
 0x637   : > { %v2248_v52 = vadd.f32 %v2247_v51, %v4570_v28 }
 0x639   : > { %2249 = vst [vmem:[#allocation3] sm:$0xff] %v2248_v52 }
 0x63a PF: > { %p2970_p4 = scmp.le.s32.totalorder %s4072_s3, 0 }
 0x63c   : > { %2253 = sbr.rel (%p2970_p4) target bundleno = 1605 (0x645), region = 208 }
 0x641   : > { %v2254_v53 = vld [vmem:[#allocation3] sm:$0xff] }
 0x642   : > { %v2255_v54 = vadd.f32 %v2254_v53, %v4570_v28 }
 0x644   : > { %2256 = vst [vmem:[#allocation3] sm:$0xff] %v2255_v54 }
 0x645 PF: > { %v2258_v55 = vperm.slane %v4550_v5, 0  ;;  %v2262_v57 = vmul.f32 %v4566_v22, %v4562_v20  ;;  %p2971_p6 = scmp.ne.s32.totalorder %s4072_s3, 6 }
 0x647   : > { %v2260_v56 = vmul.f32 %v2258_v55, %v4553_v7 }
 0x649   : > { %v2261_v58 = vadd.f32 %v2260_v56, %v4506_v9 }
 0x64a   : > { %2269 = sbr.rel (%p2971_p6) target bundleno = 1617 (0x651), region = 212 }
 0x64b   : > { %v2263_v59 = vadd.f32 %v2262_v57, %v2261_v58 }
 0x64d   : > { %2264 = vst [vmem:[#allocation2] sm:$0xff] %v2263_v59 }
 0x64e   : > { %2265 = vst [vmem:[%s4494_s8] sm:$0xff] %v2263_v59 }
 0x64f   : > { %v2270_v60 = vld [vmem:[#allocation3] sm:$0xff]  ;;  %2272 = vst [vmem:[#allocation34] sm:$0xff] %v2263_v59 }
 0x650   : > { %2271 = vst [vmem:[#allocation33] sm:$0xff] %v2270_v60 }
 0x651 PF: > { %s4787_s15 = sld [smem:[#allocation79_spill]]  ;;  %s3906_s20 = smov [#allocation33]  }
 0x652   : > { %s2284_s4 = sshll.u32 %s3906_s20, 4  ;;  %p4788_p13 = scmp.eq.s32.totalorder %s4072_s3, 6  ;;  %s2285_s4 = int_to_ptr.vmem [resolvable:$true] %s2284_s4 }
 0x653   : > { %s3907_s26 = smov [#allocation34]   ;;  %s4789_s2 = sld [smem:[#allocation80_spill]] }
 0x654   : > { %s2296_s12 = sshll.u32 %s3907_s26, 4  ;;  %p4791_p1 = pmov %p4788_p13  ;;  %s2297_s12 = int_to_ptr.vmem [resolvable:$true] %s2296_s12 }
 0x655   : > { %s2975_s13 = sshll.u32 %s4072_s3, 3  ;;  %s4792_s24 = sld [smem:[#allocation81_spill]] }
 0x656   : > { %s2310_s27 = sshll.u32 %s4494_s8, 4  ;;  %s2274_s1 = scalar_lea.sflag [#allocation6], %s4408_s21  ;;  %s2311_s27 = int_to_ptr.vmem [resolvable:$true] %s2310_s27 }
 0x657   : > { %s2286_s17 = sshll.u32 %s4787_s15, 4  ;;  %s2287_s17 = int_to_ptr.hbm [resolvable:$true] %s2286_s17 }
 0x658   : > { %3096 = dma.vmem_to_hbm [thread:$0]  (%p4788_p13), %s2285_s4, 128, %s2287_s17, [#allocation6]  }
 0x659   : > { %s2298_s7 = sshll.u32 %s4789_s2, 4  ;;  %s2299_s7 = int_to_ptr.hbm [resolvable:$true] %s2298_s7 }
 0x65a   : > { %3098 = dma.vmem_to_hbm [thread:$0]  (%p4791_p1), %s2297_s12, 128, %s2299_s7, [#allocation35]  }
 0x65b   : > { %s2308_s6 = scalar_lea.hbm %s4792_s24, %s2975_s13  ;;  %s3796_s26 = scalar_lea.hbm %s4792_s24, 56 }
 0x65c   : > { %s2312_s11 = sshll.u32 %s2308_s6, 4  ;;  %s2313_s11 = int_to_ptr.hbm [resolvable:$true] %s2312_s11 }
 0x65d   : > { %s3790_s15 = sshra.s32 %s2313_s11, 4  ;;  %s3791_s15 = int_to_ptr.hbm [resolvable:$true] %s3790_s15 }
 0x65e   : > { %s3792_s17 = scalar_lea.hbm %s3791_s15, 8  ;;  %p3797_p10 = scmp.lt.s32.totalorder %s3791_s15, %s4792_s24 }
 0x65f   : > { %p3793_p7 = scmp.ne.s32.totalorder %s3791_s15, %s3792_s17  ;;  %p3798_p2 = scmp.lt.s32.totalorder %s3796_s26, %s3792_s17 }
 0x661   : > { %p3794_p8 = pnand %p3793_p7, %p4106_p11  ;;  %p3799_p0 = por %p3798_p2, %p3797_p10 }
 0x663   : > { %p3795_p9 = pneg %p3794_p8 }
 0x665   : > { %p3800_p3 = pnand %p3799_p0, %p3795_p9 }
 0x667   : > { %3803 = shalt.err (!%p3800_p3)
}
 0x668   : > { %3099 = dma.vmem_to_hbm [thread:$0]  (%p4106_p11), %s2311_s27, 128, %s2313_s11, %s2274_s1  }
 0x669   : > { %p4793_p5 = pmov %p4791_p1 }
 0x66a   : > { %p4794_p4 = pmov %p4791_p1 }
 0x66b   : > { %3869 = dma.done.wait (%p4793_p5), [#allocation6], 128  }
 0x66c   : > { %3871 = vsyncadd (%p4794_p4), [#allocation6], 4294967168  ;;  %p4795_p6 = pmov %p4791_p1 }
 0x66d   : > { %p4796_p13 = pmov %p4791_p1 }
 0x66e   : > { %3873 = dma.done.wait (%p4795_p6), [#allocation35], 128  }
 0x66f   : > { %3875 = vsyncadd (%p4796_p13), [#allocation35], 4294967168 }
 0x670 PF: > { %p3144_p1 = scmp.ge.s32.totalorder %s3894_s30, 2  ;;  %s4798_s8 = sadd.s32 4294967294, %s3894_s30  }
 0x671   : > { %s2334_s9 = sand.u32 1, %s4798_s8  }
 0x672   : > { %p3125_p11 = pnand %p3144_p1, %p4110_p12  ;;  %s2335_s2 = scalar_lea.sflag [#allocation6], %s2334_s9 }
 0x674   : > { %p3126_p7 = pneg %p3125_p11 }
 0x676   : > { %3877 = dma.done.wait (%p3126_p7), %s2335_s2, 128  }
 0x677   : > { %3879 = vsyncadd (%p3126_p7), %s2335_s2, 4294967168  ;;  %s4799_s30 = sld [smem:[#allocation53_spill]]  ;;  %s4802_s8 = smov %s3886_s5 }
 0x678   : > { %s4800_s0 = sld [smem:[#allocation52_spill]] }
 0x679   : > { %s4801_s9 = sld [smem:[#allocation54_spill]] }
 0x67d   : > { %p62_p8 = scmp.ge.s32.totalorder %s4799_s30, 9  }
 0x67e   : > { %s4803_s5 = smov %s4800_s0 }
 0x67f   :  { %64 = sbr.rel (!%p62_p8) target bundleno = 46 (0x2e), region = 361 }
 0x684   :  { %2341 = vsyncpa [#allocation5], 1 }
 0x685   :  { %2343 = vsyncpa [#allocation5 + $0x1], 1 }
 0x686   :  { %2344 = vsyncpa [#allocation8], 1 }
 0x687   :  { %2346 = vsyncpa [#allocation8 + $0x1], 1 }
 0x688   :  { %2347 = vsyncpa [#allocation11], 1 }
 0x689   :  { %2349 = vsyncpa [#allocation11 + $0x1], 1 }
 0x68a   :  { %2350 = vsyncpa [#allocation14], 1 }
 0x68b   :  { %2352 = vsyncpa [#allocation14 + $0x1], 1 }
 0x68c   :  { %2353 = vsyncpa [#allocation17], 1 }
 0x68d   :  { %2355 = vsyncpa [#allocation17 + $0x1], 1 }
 0x68e   :  { %2356 = vsyncpa [#allocation20], 1 }
 0x68f   :  { %2358 = vsyncpa [#allocation20 + $0x1], 1 }
 0x690   :  { %2359 = vsyncpa [#allocation23], 1 }
 0x691   :  { %2361 = vsyncpa [#allocation23 + $0x1], 1 }
 0x692   :  { %2362 = vsyncpa [#allocation26], 1 }
 0x693   :  { %2364 = vsyncpa [#allocation26 + $0x1], 1 }
 0x694   :  { %2365 = vsyncpa [#allocation29], 1 }
 0x695   :  { %2366 = vsyncpa [#allocation32], 1 }
 0x696   :  { %2367 = vsyncpa [#allocation6], 1 }
 0x697   :  { %2369 = vsyncpa [#allocation6 + $0x1], 1 }
 0x698   :  { %2370 = vsyncpa [#allocation35], 1 }

</bundles_post_ra>
